<compile_context>
chip_gen: v7x
topology: tpu7x:2x2x1
jax: 0.10.0
libtpu: 0.0.40
codegen_flags: <defaults>
</compile_context>

<pallas_src>
import jax
import jax.numpy as jnp
from jax.experimental import pallas as pl
from jax.experimental.pallas import tpu as pltpu


# ----------------------------- kernels --------------------------------------

def conv1x1_bn_relu_kernel(x_ref, w_ref, scale_ref, shift_ref, o_ref):
    # x_ref:     (tile_b, 128, hw)  input dtype (f32), NCHW channel-major view
    # w_ref:     (32, 128)          compute dtype
    # scale/shift: (32, 1)          f32 (conv bias + BN folded)
    # o_ref:     (tile_b, 32, hw)   compute dtype  (== PyTorch (c,h,w) order)
    w = w_ref[...]
    scale = scale_ref[...]
    shift = shift_ref[...]
    for b in range(o_ref.shape[0]):          # static unroll over the batch tile
        xb = x_ref[b].astype(w.dtype)        # (128, hw); bf16 cast in-kernel
        y = jnp.dot(w, xb, preferred_element_type=jnp.float32)   # (32, hw)
        y = y * scale + shift
        o_ref[b] = jnp.maximum(y, 0.0).astype(o_ref.dtype)


def fc_softmax_kernel(h_ref, w_ref, b_ref, o_ref):
    # h_ref: (tile_b, f_in) compute dtype; w_ref: (f_in, a_pad) compute dtype
    # b_ref: (1, a_pad) f32 (padded cols = -1e30); o_ref: (tile_b, a_pad) f32
    logits = jnp.dot(h_ref[...], w_ref[...], preferred_element_type=jnp.float32)
    logits = logits + b_ref[...]
    # exp(log_softmax(x, dim=1)) == softmax(x, dim=1), numerically stabilized.
    m = jnp.max(logits, axis=-1, keepdims=True)
    e = jnp.exp(logits - m)
    denom = jnp.sum(e, axis=-1, keepdims=True)
    o_ref[...] = e / denom                   # exact: rows sum to 1


# ----------------------------- helpers --------------------------------------

def _vmem_limit():
    """Generation-aware scoped-VMEM budget: ~70% of physical, clamped.
    ~90MB on v5e/v6e (128 MiB), ~45MB on v7x (64 MiB)."""
    cap = None
    try:
        info = pltpu.get_tpu_info()
        cap = getattr(info, "vmem_capacity_bytes", None)
    except Exception:
        cap = None
    if not cap:
        cap = 128 * 1024 * 1024
    return int(max(32 * 1024 * 1024, min(int(cap * 0.7), 96 * 1024 * 1024)))


def _batch_tile(B, cap, unit=1, min_steps=2):
    """Largest divisor of B that is <= cap and (a multiple of `unit` or == B),
    preferring a tiling with >= min_steps grid steps (feeds both v7x TCs).
    Never returns a tile larger than `cap` (no full-dimension fallback)."""
    cap = max(1, min(cap, B))
    candidates = [t for t in range(cap, 0, -1)
                  if B % t == 0 and (t % unit == 0 or t == B)]
    if not candidates:
        candidates = [t for t in range(cap, 0, -1) if B % t == 0]  # has 1
    for t in candidates:                       # descending -> largest first
        if B // t >= min_steps:
            return t
    return candidates[0]


def init_params(key, board_dim, action_size):
    H, W = board_dim
    f_in = H * W * 32
    ks = jax.random.split(key, 8)
    return {
        "conv1_w": jax.random.normal(ks[0], (32, 128, 1, 1), jnp.float32) * 0.05,
        "conv1_b": jax.random.normal(ks[1], (32,), jnp.float32) * 0.05,
        "bn1_gamma": 1.0 + 0.1 * jax.random.normal(ks[2], (32,), jnp.float32),
        "bn1_beta": 0.1 * jax.random.normal(ks[3], (32,), jnp.float32),
        "bn1_mean": 0.1 * jax.random.normal(ks[4], (32,), jnp.float32),
        "bn1_var": jnp.abs(jax.random.normal(ks[5], (32,), jnp.float32)) + 0.5,
        "fc_w": jax.random.normal(ks[6], (action_size, f_in), jnp.float32) * 0.05,
        "fc_b": jax.random.normal(ks[7], (action_size,), jnp.float32) * 0.05,
    }


def prepare_params(params, board_dim, action_size,
                   compute_dtype=jnp.bfloat16, eps=1e-5):
    """One-time parameter preparation (hoisted off the forward hot path)."""
    H, W = board_dim
    f_in = H * W * 32
    a_pad = max(128, ((action_size + 127) // 128) * 128)

    # Conv weight kept as (32 out, 128 in): the kernel does W @ x_b directly.
    w_conv = params["conv1_w"].reshape(32, 128).astype(compute_dtype)

    # Fold conv bias + BatchNorm (eval mode) into per-channel scale/shift.
    scale = params["bn1_gamma"] / jnp.sqrt(params["bn1_var"] + eps)
    shift = (params["conv1_b"] - params["bn1_mean"]) * scale + params["bn1_beta"]

    # Channel-major conv output == PyTorch's (c,h,w) flatten order, so the fc
    # weight only needs transpose + lane padding (no permutation).  Padded
    # action columns get zero weights and bias -1e30 -> zero probability.
    wf = jnp.transpose(params["fc_w"])                       # (f_in, A)
    wf = jnp.pad(wf, ((0, 0), (0, a_pad - action_size))).astype(compute_dtype)
    bf = jnp.pad(params["fc_b"].astype(jnp.float32),
                 (0, a_pad - action_size), constant_values=-1e30)

    return {
        "w_conv": w_conv,                                    # (32, 128)
        "scale": scale.reshape(32, 1).astype(jnp.float32),
        "shift": shift.reshape(32, 1).astype(jnp.float32),
        "w_fc": wf,                                          # (f_in, a_pad)
        "b_fc": bf.reshape(1, a_pad),                        # (1, a_pad) f32
    }


# ----------------------------- forward --------------------------------------

def policy_head_forward(x, prepared, board_dim, action_size,
                        compute_dtype=jnp.bfloat16,
                        conv_rows_cap=4096, fc_batch_tile_cap=256):
    B, C, H, W = x.shape
    assert C == 128 and (H, W) == tuple(board_dim)
    hw = H * W
    f_in = hw * 32
    a_pad = prepared["w_fc"].shape[1]
    itemsize = jnp.dtype(compute_dtype).itemsize
    sub_unit = 8 if itemsize == 4 else 16
    vmem = _vmem_limit()

    # ---- conv1 (1x1) + bn1 (eval) + relu -----------------------------------
    # x presented as a FREE (B, 128, hw) view of NCHW: no transpose, no wrapper
    # cast.  Grid over batch tiles; ~conv_rows_cap activation rows per step.
    x3 = x.reshape(B, C, hw)
    tile_b1 = _batch_tile(B, max(1, conv_rows_cap // hw), unit=1, min_steps=2)

    cost1 = pl.CostEstimate(
        flops=2 * B * hw * C * 32,
        transcendentals=0,
        bytes_accessed=int(B * C * hw * x.dtype.itemsize
                           + 32 * C * itemsize
                           + B * 32 * hw * itemsize + 2 * 32 * 4),
    )
    h = pl.pallas_call(
        conv1x1_bn_relu_kernel,
        out_shape=jax.ShapeDtypeStruct((B, 32, hw), compute_dtype),
        grid=(B // tile_b1,),
        in_specs=[
            pl.BlockSpec((tile_b1, C, hw), lambda i: (i, 0, 0)),
            pl.BlockSpec((32, C), lambda i: (0, 0)),
            pl.BlockSpec((32, 1), lambda i: (0, 0)),
            pl.BlockSpec((32, 1), lambda i: (0, 0)),
        ],
        out_specs=pl.BlockSpec((tile_b1, 32, hw), lambda i: (i, 0, 0)),
        compiler_params=pltpu.CompilerParams(
            dimension_semantics=("parallel",), vmem_limit_bytes=vmem),
        cost_estimate=cost1,
    )(x3, prepared["w_conv"], prepared["scale"], prepared["shift"])

    # Channel-major rows -> PyTorch .view(-1, 32*H*W): a free row-major view.
    h_flat = h.reshape(B, f_in)

    # ---- fc + softmax over batch tiles, lane-dense padded action dim --------
    tile_b2 = _batch_tile(B, fc_batch_tile_cap, unit=sub_unit, min_steps=2)

    wf_bytes = f_in * a_pad * itemsize
    if wf_bytes > 8 * 1024 * 1024:
        # v7x (64 MiB VMEM) guard: don't double-buffer the grid-invariant weight.
        wf_spec = pl.BlockSpec((f_in, a_pad), lambda i: (0, 0),
                               pipeline_mode=pl.Buffered(1))
    else:
        wf_spec = pl.BlockSpec((f_in, a_pad), lambda i: (0, 0))

    cost2 = pl.CostEstimate(
        flops=2 * B * f_in * a_pad + 5 * B * a_pad,
        transcendentals=B * a_pad,
        bytes_accessed=int((B * f_in + f_in * a_pad) * itemsize
                           + (B * a_pad + a_pad) * 4),
    )
    out = pl.pallas_call(
        fc_softmax_kernel,
        out_shape=jax.ShapeDtypeStruct((B, a_pad), jnp.float32),
        grid=(B // tile_b2,),
        in_specs=[
            pl.BlockSpec((tile_b2, f_in), lambda i: (i, 0)),
            wf_spec,
            pl.BlockSpec((1, a_pad), lambda i: (0, 0)),
        ],
        out_specs=pl.BlockSpec((tile_b2, a_pad), lambda i: (i, 0)),
        compiler_params=pltpu.CompilerParams(
            dimension_semantics=("parallel",), vmem_limit_bytes=vmem),
        cost_estimate=cost2,
    )(h_flat, prepared["w_fc"], prepared["b_fc"])

    return out[:, :action_size]


# ----------------------------- reference ------------------------------------

def reference_forward(x, params, board_dim, action_size):
    # Plain-JAX reference mirroring the PyTorch forward (NCHW semantics).
    H, W = board_dim
    B = x.shape[0]
    w = params["conv1_w"].reshape(32, 128)
    y = jnp.einsum("bchw,oc->bohw", x, w) + params["conv1_b"][None, :, None, None]
    eps = 1e-5
    y = (y - params["bn1_mean"][None, :, None, None]) / jnp.sqrt(
        params["bn1_var"][None, :, None, None] + eps)
    y = y * params["bn1_gamma"][None, :, None, None] + params["bn1_beta"][None, :, None, None]
    y = jnp.maximum(y, 0.0)
    y = y.reshape(B, 32 * H * W)                      # PyTorch .view(-1, 32*H*W)
    logits = y @ params["fc_w"].T + params["fc_b"]
    return jax.nn.softmax(logits, axis=-1)            # logsoftmax(dim=1).exp()


# ----------------------------- demo / check ---------------------------------

if __name__ == "__main__":
    board_dim = (8, 8)       # self.board_dim
    action_size = 65         # self.action_size (output_planes <= 1 branch)
    B = 16

    key = jax.random.PRNGKey(0)
    k_x, k_p = jax.random.split(key)
    x = jax.random.normal(k_x, (B, 128, *board_dim), jnp.float32)   # NCHW input
    params = init_params(k_p, board_dim, action_size)

    ref = reference_forward(x, params, board_dim, action_size)

    # --- f32 matmul operands (tight check) ---
    prep32 = prepare_params(params, board_dim, action_size, jnp.float32)
    fwd32 = jax.jit(lambda xx: policy_head_forward(
        xx, prep32, board_dim, action_size, compute_dtype=jnp.float32))
    out32 = jax.block_until_ready(fwd32(x))
    assert out32.shape == (B, action_size)
    assert jnp.allclose(out32, ref, atol=2e-3, rtol=1e-3)
    assert jnp.allclose(jnp.sum(out32, axis=-1), 1.0, atol=1e-4)

    # --- bf16 (default) matmul operands with f32 accumulation (loose check) ---
    prep16 = prepare_params(params, board_dim, action_size)          # bf16 default
    fwd16 = jax.jit(lambda xx: policy_head_forward(
        xx, prep16, board_dim, action_size))
    out16 = jax.block_until_ready(fwd16(x))
    assert out16.shape == (B, action_size)
    assert jnp.allclose(out16, ref, atol=5e-2)
    assert jnp.allclose(jnp.sum(out16, axis=-1), 1.0, atol=1e-3)

    print("KERNEL_OK")
</pallas_src>

<mosaic_0001>
module attributes {stable_mosaic.version = 11 : i64} {
  func.func @conv1x1_bn_relu_kernel(%arg0: i32, %arg1: memref<8x128x64xf32, #tpu.memory_space<vmem>>, %arg2: memref<32x128xf32, #tpu.memory_space<vmem>>, %arg3: memref<32x1xf32, #tpu.memory_space<vmem>>, %arg4: memref<32x1xf32, #tpu.memory_space<vmem>>, %arg5: memref<8x32x64xf32, #tpu.memory_space<vmem>>) attributes {dimension_semantics = [#tpu.dimension_semantics<parallel>], iteration_bounds = array<i64: 2>, scalar_prefetch = 0 : i64, scratch_operands = 0 : i64, tpu.core_type = #tpu.core_type<tc>, window_params = [{transform_indices = @transform_0, window_bounds = array<i64: 8, 128, 64>}, {pipeline_mode = #tpu.pipeline_mode<synchronous>, transform_indices = @transform_1, window_bounds = array<i64: 32, 128>}, {pipeline_mode = #tpu.pipeline_mode<synchronous>, transform_indices = @transform_2, window_bounds = array<i64: 32, 1>}, {pipeline_mode = #tpu.pipeline_mode<synchronous>, transform_indices = @transform_3, window_bounds = array<i64: 32, 1>}, {transform_indices = @transform_4, window_bounds = array<i64: 8, 32, 64>}]} {
    %c0 = arith.constant 0 : index
    %c0_0 = arith.constant 0 : index
    %0 = vector.load %arg2[%c0, %c0_0] : memref<32x128xf32, #tpu.memory_space<vmem>>, vector<32x128xf32>
    %c0_1 = arith.constant 0 : index
    %c0_2 = arith.constant 0 : index
    %1 = vector.load %arg3[%c0_1, %c0_2] : memref<32x1xf32, #tpu.memory_space<vmem>>, vector<32x1xf32>
    %c0_3 = arith.constant 0 : index
    %c0_4 = arith.constant 0 : index
    %2 = vector.load %arg4[%c0_3, %c0_4] : memref<32x1xf32, #tpu.memory_space<vmem>>, vector<32x1xf32>
    %c0_5 = arith.constant 0 : index
    %c0_6 = arith.constant 0 : index
    %c0_7 = arith.constant 0 : index
    %3 = vector.load %arg1[%c0_5, %c0_6, %c0_7] : memref<8x128x64xf32, #tpu.memory_space<vmem>>, vector<1x128x64xf32>
    %4 = vector.shape_cast %3 : vector<1x128x64xf32> to vector<128x64xf32>
    %cst = arith.constant dense<0.000000e+00> : vector<32x64xf32>
    %5 = tpu.matmul %0, %4, %cst {dimension_numbers = #tpu.dot_dimension_numbers<[1], [0], [0], [1], [0, 0, 1, 1], [], []>} : vector<32x128xf32>, vector<128x64xf32>, vector<32x64xf32> -> vector<32x64xf32>
    %6 = vector.broadcast %1 : vector<32x1xf32> to vector<32x64xf32>
    %7 = arith.mulf %5, %6 : vector<32x64xf32>
    %8 = vector.broadcast %2 : vector<32x1xf32> to vector<32x64xf32>
    %9 = arith.addf %7, %8 : vector<32x64xf32>
    %cst_8 = arith.constant 0.000000e+00 : f32
    %10 = vector.broadcast %cst_8 : f32 to vector<32x64xf32>
    %11 = arith.maximumf %9, %10 : vector<32x64xf32>
    %c0_9 = arith.constant 0 : index
    %c0_10 = arith.constant 0 : index
    %c0_11 = arith.constant 0 : index
    %12 = vector.load %arg5[%c0_9, %c0_10, %c0_11] : memref<8x32x64xf32, #tpu.memory_space<vmem>>, vector<1x32x64xf32>
    %13 = vector.shape_cast %12 : vector<1x32x64xf32> to vector<32x64xf32>
    %14 = vector.shape_cast %11 : vector<32x64xf32> to vector<1x32x64xf32>
    tpu.vector_store %arg5[%c0_9, %c0_10, %c0_11], %14 {strides = array<i32>} : memref<8x32x64xf32, #tpu.memory_space<vmem>>, vector<1x32x64xf32>,
    %c1 = arith.constant 1 : index
    %c0_12 = arith.constant 0 : index
    %c0_13 = arith.constant 0 : index
    %15 = vector.load %arg1[%c1, %c0_12, %c0_13] : memref<8x128x64xf32, #tpu.memory_space<vmem>>, vector<1x128x64xf32>
    %16 = vector.shape_cast %15 : vector<1x128x64xf32> to vector<128x64xf32>
    %cst_14 = arith.constant dense<0.000000e+00> : vector<32x64xf32>
    %17 = tpu.matmul %0, %16, %cst_14 {dimension_numbers = #tpu.dot_dimension_numbers<[1], [0], [0], [1], [0, 0, 1, 1], [], []>} : vector<32x128xf32>, vector<128x64xf32>, vector<32x64xf32> -> vector<32x64xf32>
    %18 = vector.broadcast %1 : vector<32x1xf32> to vector<32x64xf32>
    %19 = arith.mulf %17, %18 : vector<32x64xf32>
    %20 = vector.broadcast %2 : vector<32x1xf32> to vector<32x64xf32>
    %21 = arith.addf %19, %20 : vector<32x64xf32>
    %cst_15 = arith.constant 0.000000e+00 : f32
    %22 = vector.broadcast %cst_15 : f32 to vector<32x64xf32>
    %23 = arith.maximumf %21, %22 : vector<32x64xf32>
    %c1_16 = arith.constant 1 : index
    %c0_17 = arith.constant 0 : index
    %c0_18 = arith.constant 0 : index
    %24 = vector.load %arg5[%c1_16, %c0_17, %c0_18] : memref<8x32x64xf32, #tpu.memory_space<vmem>>, vector<1x32x64xf32>
    %25 = vector.shape_cast %24 : vector<1x32x64xf32> to vector<32x64xf32>
    %26 = vector.shape_cast %23 : vector<32x64xf32> to vector<1x32x64xf32>
    tpu.vector_store %arg5[%c1_16, %c0_17, %c0_18], %26 {strides = array<i32>} : memref<8x32x64xf32, #tpu.memory_space<vmem>>, vector<1x32x64xf32>,
    %c2 = arith.constant 2 : index
    %c0_19 = arith.constant 0 : index
    %c0_20 = arith.constant 0 : index
    %27 = vector.load %arg1[%c2, %c0_19, %c0_20] : memref<8x128x64xf32, #tpu.memory_space<vmem>>, vector<1x128x64xf32>
    %28 = vector.shape_cast %27 : vector<1x128x64xf32> to vector<128x64xf32>
    %cst_21 = arith.constant dense<0.000000e+00> : vector<32x64xf32>
    %29 = tpu.matmul %0, %28, %cst_21 {dimension_numbers = #tpu.dot_dimension_numbers<[1], [0], [0], [1], [0, 0, 1, 1], [], []>} : vector<32x128xf32>, vector<128x64xf32>, vector<32x64xf32> -> vector<32x64xf32>
    %30 = vector.broadcast %1 : vector<32x1xf32> to vector<32x64xf32>
    %31 = arith.mulf %29, %30 : vector<32x64xf32>
    %32 = vector.broadcast %2 : vector<32x1xf32> to vector<32x64xf32>
    %33 = arith.addf %31, %32 : vector<32x64xf32>
    %cst_22 = arith.constant 0.000000e+00 : f32
    %34 = vector.broadcast %cst_22 : f32 to vector<32x64xf32>
    %35 = arith.maximumf %33, %34 : vector<32x64xf32>
    %c2_23 = arith.constant 2 : index
    %c0_24 = arith.constant 0 : index
    %c0_25 = arith.constant 0 : index
    %36 = vector.load %arg5[%c2_23, %c0_24, %c0_25] : memref<8x32x64xf32, #tpu.memory_space<vmem>>, vector<1x32x64xf32>
    %37 = vector.shape_cast %36 : vector<1x32x64xf32> to vector<32x64xf32>
    %38 = vector.shape_cast %35 : vector<32x64xf32> to vector<1x32x64xf32>
    tpu.vector_store %arg5[%c2_23, %c0_24, %c0_25], %38 {strides = array<i32>} : memref<8x32x64xf32, #tpu.memory_space<vmem>>, vector<1x32x64xf32>,
    %c3 = arith.constant 3 : index
    %c0_26 = arith.constant 0 : index
    %c0_27 = arith.constant 0 : index
    %39 = vector.load %arg1[%c3, %c0_26, %c0_27] : memref<8x128x64xf32, #tpu.memory_space<vmem>>, vector<1x128x64xf32>
    %40 = vector.shape_cast %39 : vector<1x128x64xf32> to vector<128x64xf32>
    %cst_28 = arith.constant dense<0.000000e+00> : vector<32x64xf32>
    %41 = tpu.matmul %0, %40, %cst_28 {dimension_numbers = #tpu.dot_dimension_numbers<[1], [0], [0], [1], [0, 0, 1, 1], [], []>} : vector<32x128xf32>, vector<128x64xf32>, vector<32x64xf32> -> vector<32x64xf32>
    %42 = vector.broadcast %1 : vector<32x1xf32> to vector<32x64xf32>
    %43 = arith.mulf %41, %42 : vector<32x64xf32>
    %44 = vector.broadcast %2 : vector<32x1xf32> to vector<32x64xf32>
    %45 = arith.addf %43, %44 : vector<32x64xf32>
    %cst_29 = arith.constant 0.000000e+00 : f32
    %46 = vector.broadcast %cst_29 : f32 to vector<32x64xf32>
    %47 = arith.maximumf %45, %46 : vector<32x64xf32>
    %c3_30 = arith.constant 3 : index
    %c0_31 = arith.constant 0 : index
    %c0_32 = arith.constant 0 : index
    %48 = vector.load %arg5[%c3_30, %c0_31, %c0_32] : memref<8x32x64xf32, #tpu.memory_space<vmem>>, vector<1x32x64xf32>
    %49 = vector.shape_cast %48 : vector<1x32x64xf32> to vector<32x64xf32>
    %50 = vector.shape_cast %47 : vector<32x64xf32> to vector<1x32x64xf32>
    tpu.vector_store %arg5[%c3_30, %c0_31, %c0_32], %50 {strides = array<i32>} : memref<8x32x64xf32, #tpu.memory_space<vmem>>, vector<1x32x64xf32>,
    %c4 = arith.constant 4 : index
    %c0_33 = arith.constant 0 : index
    %c0_34 = arith.constant 0 : index
    %51 = vector.load %arg1[%c4, %c0_33, %c0_34] : memref<8x128x64xf32, #tpu.memory_space<vmem>>, vector<1x128x64xf32>
    %52 = vector.shape_cast %51 : vector<1x128x64xf32> to vector<128x64xf32>
    %cst_35 = arith.constant dense<0.000000e+00> : vector<32x64xf32>
    %53 = tpu.matmul %0, %52, %cst_35 {dimension_numbers = #tpu.dot_dimension_numbers<[1], [0], [0], [1], [0, 0, 1, 1], [], []>} : vector<32x128xf32>, vector<128x64xf32>, vector<32x64xf32> -> vector<32x64xf32>
    %54 = vector.broadcast %1 : vector<32x1xf32> to vector<32x64xf32>
    %55 = arith.mulf %53, %54 : vector<32x64xf32>
    %56 = vector.broadcast %2 : vector<32x1xf32> to vector<32x64xf32>
    %57 = arith.addf %55, %56 : vector<32x64xf32>
    %cst_36 = arith.constant 0.000000e+00 : f32
    %58 = vector.broadcast %cst_36 : f32 to vector<32x64xf32>
    %59 = arith.maximumf %57, %58 : vector<32x64xf32>
    %c4_37 = arith.constant 4 : index
    %c0_38 = arith.constant 0 : index
    %c0_39 = arith.constant 0 : index
    %60 = vector.load %arg5[%c4_37, %c0_38, %c0_39] : memref<8x32x64xf32, #tpu.memory_space<vmem>>, vector<1x32x64xf32>
    %61 = vector.shape_cast %60 : vector<1x32x64xf32> to vector<32x64xf32>
    %62 = vector.shape_cast %59 : vector<32x64xf32> to vector<1x32x64xf32>
    tpu.vector_store %arg5[%c4_37, %c0_38, %c0_39], %62 {strides = array<i32>} : memref<8x32x64xf32, #tpu.memory_space<vmem>>, vector<1x32x64xf32>,
    %c5 = arith.constant 5 : index
    %c0_40 = arith.constant 0 : index
    %c0_41 = arith.constant 0 : index
    %63 = vector.load %arg1[%c5, %c0_40, %c0_41] : memref<8x128x64xf32, #tpu.memory_space<vmem>>, vector<1x128x64xf32>
    %64 = vector.shape_cast %63 : vector<1x128x64xf32> to vector<128x64xf32>
    %cst_42 = arith.constant dense<0.000000e+00> : vector<32x64xf32>
    %65 = tpu.matmul %0, %64, %cst_42 {dimension_numbers = #tpu.dot_dimension_numbers<[1], [0], [0], [1], [0, 0, 1, 1], [], []>} : vector<32x128xf32>, vector<128x64xf32>, vector<32x64xf32> -> vector<32x64xf32>
    %66 = vector.broadcast %1 : vector<32x1xf32> to vector<32x64xf32>
    %67 = arith.mulf %65, %66 : vector<32x64xf32>
    %68 = vector.broadcast %2 : vector<32x1xf32> to vector<32x64xf32>
    %69 = arith.addf %67, %68 : vector<32x64xf32>
    %cst_43 = arith.constant 0.000000e+00 : f32
    %70 = vector.broadcast %cst_43 : f32 to vector<32x64xf32>
    %71 = arith.maximumf %69, %70 : vector<32x64xf32>
    %c5_44 = arith.constant 5 : index
    %c0_45 = arith.constant 0 : index
    %c0_46 = arith.constant 0 : index
    %72 = vector.load %arg5[%c5_44, %c0_45, %c0_46] : memref<8x32x64xf32, #tpu.memory_space<vmem>>, vector<1x32x64xf32>
    %73 = vector.shape_cast %72 : vector<1x32x64xf32> to vector<32x64xf32>
    %74 = vector.shape_cast %71 : vector<32x64xf32> to vector<1x32x64xf32>
    tpu.vector_store %arg5[%c5_44, %c0_45, %c0_46], %74 {strides = array<i32>} : memref<8x32x64xf32, #tpu.memory_space<vmem>>, vector<1x32x64xf32>,
    %c6 = arith.constant 6 : index
    %c0_47 = arith.constant 0 : index
    %c0_48 = arith.constant 0 : index
    %75 = vector.load %arg1[%c6, %c0_47, %c0_48] : memref<8x128x64xf32, #tpu.memory_space<vmem>>, vector<1x128x64xf32>
    %76 = vector.shape_cast %75 : vector<1x128x64xf32> to vector<128x64xf32>
    %cst_49 = arith.constant dense<0.000000e+00> : vector<32x64xf32>
    %77 = tpu.matmul %0, %76, %cst_49 {dimension_numbers = #tpu.dot_dimension_numbers<[1], [0], [0], [1], [0, 0, 1, 1], [], []>} : vector<32x128xf32>, vector<128x64xf32>, vector<32x64xf32> -> vector<32x64xf32>
    %78 = vector.broadcast %1 : vector<32x1xf32> to vector<32x64xf32>
    %79 = arith.mulf %77, %78 : vector<32x64xf32>
    %80 = vector.broadcast %2 : vector<32x1xf32> to vector<32x64xf32>
    %81 = arith.addf %79, %80 : vector<32x64xf32>
    %cst_50 = arith.constant 0.000000e+00 : f32
    %82 = vector.broadcast %cst_50 : f32 to vector<32x64xf32>
    %83 = arith.maximumf %81, %82 : vector<32x64xf32>
    %c6_51 = arith.constant 6 : index
    %c0_52 = arith.constant 0 : index
    %c0_53 = arith.constant 0 : index
    %84 = vector.load %arg5[%c6_51, %c0_52, %c0_53] : memref<8x32x64xf32, #tpu.memory_space<vmem>>, vector<1x32x64xf32>
    %85 = vector.shape_cast %84 : vector<1x32x64xf32> to vector<32x64xf32>
    %86 = vector.shape_cast %83 : vector<32x64xf32> to vector<1x32x64xf32>
    tpu.vector_store %arg5[%c6_51, %c0_52, %c0_53], %86 {strides = array<i32>} : memref<8x32x64xf32, #tpu.memory_space<vmem>>, vector<1x32x64xf32>,
    %c7 = arith.constant 7 : index
    %c0_54 = arith.constant 0 : index
    %c0_55 = arith.constant 0 : index
    %87 = vector.load %arg1[%c7, %c0_54, %c0_55] : memref<8x128x64xf32, #tpu.memory_space<vmem>>, vector<1x128x64xf32>
    %88 = vector.shape_cast %87 : vector<1x128x64xf32> to vector<128x64xf32>
    %cst_56 = arith.constant dense<0.000000e+00> : vector<32x64xf32>
    %89 = tpu.matmul %0, %88, %cst_56 {dimension_numbers = #tpu.dot_dimension_numbers<[1], [0], [0], [1], [0, 0, 1, 1], [], []>} : vector<32x128xf32>, vector<128x64xf32>, vector<32x64xf32> -> vector<32x64xf32>
    %90 = vector.broadcast %1 : vector<32x1xf32> to vector<32x64xf32>
    %91 = arith.mulf %89, %90 : vector<32x64xf32>
    %92 = vector.broadcast %2 : vector<32x1xf32> to vector<32x64xf32>
    %93 = arith.addf %91, %92 : vector<32x64xf32>
    %cst_57 = arith.constant 0.000000e+00 : f32
    %94 = vector.broadcast %cst_57 : f32 to vector<32x64xf32>
    %95 = arith.maximumf %93, %94 : vector<32x64xf32>
    %c7_58 = arith.constant 7 : index
    %c0_59 = arith.constant 0 : index
    %c0_60 = arith.constant 0 : index
    %96 = vector.load %arg5[%c7_58, %c0_59, %c0_60] : memref<8x32x64xf32, #tpu.memory_space<vmem>>, vector<1x32x64xf32>
    %97 = vector.shape_cast %96 : vector<1x32x64xf32> to vector<32x64xf32>
    %98 = vector.shape_cast %95 : vector<32x64xf32> to vector<1x32x64xf32>
    tpu.vector_store %arg5[%c7_58, %c0_59, %c0_60], %98 {strides = array<i32>} : memref<8x32x64xf32, #tpu.memory_space<vmem>>, vector<1x32x64xf32>,
    return
  }
  func.func @transform_0(%arg0: i32) -> (i32, i32, i32) {
    %c0_i32 = arith.constant 0 : i32
    %c0_i32_0 = arith.constant 0 : i32
    %c0_i32_1 = arith.constant 0 : i32
    return %arg0, %c0_i32, %c0_i32_0 : i32, i32, i32
  }
  func.func @transform_1(%arg0: i32) -> (i32, i32) {
    %c0_i32 = arith.constant 0 : i32
    %c0_i32_0 = arith.constant 0 : i32
    %c0_i32_1 = arith.constant 0 : i32
    return %c0_i32, %c0_i32_0 : i32, i32
  }
  func.func @transform_2(%arg0: i32) -> (i32, i32) {
    %c0_i32 = arith.constant 0 : i32
    %c0_i32_0 = arith.constant 0 : i32
    %c0_i32_1 = arith.constant 0 : i32
    return %c0_i32, %c0_i32_0 : i32, i32
  }
  func.func @transform_3(%arg0: i32) -> (i32, i32) {
    %c0_i32 = arith.constant 0 : i32
    %c0_i32_0 = arith.constant 0 : i32
    %c0_i32_1 = arith.constant 0 : i32
    return %c0_i32, %c0_i32_0 : i32, i32
  }
  func.func @transform_4(%arg0: i32) -> (i32, i32, i32) {
    %c0_i32 = arith.constant 0 : i32
    %c0_i32_0 = arith.constant 0 : i32
    %c0_i32_1 = arith.constant 0 : i32
    return %arg0, %c0_i32, %c0_i32_0 : i32, i32, i32
  }
}

module attributes {stable_mosaic.version = 11 : i64} {
  func.func @fc_softmax_kernel(%arg0: i32, %arg1: memref<8x2048xf32, #tpu.memory_space<vmem>>, %arg2: memref<2048x128xf32, #tpu.memory_space<vmem>>, %arg3: memref<1x128xf32, #tpu.memory_space<vmem>>, %arg4: memref<8x128xf32, #tpu.memory_space<vmem>>) attributes {dimension_semantics = [#tpu.dimension_semantics<parallel>], iteration_bounds = array<i64: 2>, scalar_prefetch = 0 : i64, scratch_operands = 0 : i64, tpu.core_type = #tpu.core_type<tc>, window_params = [{transform_indices = @transform_0, window_bounds = array<i64: 8, 2048>}, {pipeline_mode = #tpu.pipeline_mode<synchronous>, transform_indices = @transform_1, window_bounds = array<i64: 2048, 128>}, {pipeline_mode = #tpu.pipeline_mode<synchronous>, transform_indices = @transform_2, window_bounds = array<i64: 1, 128>}, {transform_indices = @transform_3, window_bounds = array<i64: 8, 128>}]} {
    %c0 = arith.constant 0 : index
    %c0_0 = arith.constant 0 : index
    %0 = vector.load %arg1[%c0, %c0_0] : memref<8x2048xf32, #tpu.memory_space<vmem>>, vector<8x2048xf32>
    %c0_1 = arith.constant 0 : index
    %c0_2 = arith.constant 0 : index
    %1 = vector.load %arg2[%c0_1, %c0_2] : memref<2048x128xf32, #tpu.memory_space<vmem>>, vector<2048x128xf32>
    %cst = arith.constant dense<0.000000e+00> : vector<8x128xf32>
    %2 = tpu.matmul %0, %1, %cst {dimension_numbers = #tpu.dot_dimension_numbers<[1], [0], [0], [1], [0, 0, 1, 1], [], []>} : vector<8x2048xf32>, vector<2048x128xf32>, vector<8x128xf32> -> vector<8x128xf32>
    %c0_3 = arith.constant 0 : index
    %c0_4 = arith.constant 0 : index
    %3 = vector.load %arg3[%c0_3, %c0_4] : memref<1x128xf32, #tpu.memory_space<vmem>>, vector<1x128xf32>
    %4 = vector.broadcast %3 : vector<1x128xf32> to vector<8x128xf32>
    %5 = arith.addf %2, %4 : vector<8x128xf32>
    %cst_5 = arith.constant dense<0xFF800000> : vector<8xf32>
    %6 = vector.multi_reduction <maximumf>, %5, %cst_5 [1] : vector<8x128xf32> to vector<8xf32>
    %7 = vector.shape_cast %6 : vector<8xf32> to vector<8x1xf32>
    %8 = vector.broadcast %7 : vector<8x1xf32> to vector<8x128xf32>
    %9 = arith.subf %5, %8 : vector<8x128xf32>
    %10 = math.exp %9 : vector<8x128xf32>
    %cst_6 = arith.constant dense<0.000000e+00> : vector<8xf32>
    %11 = vector.multi_reduction <add>, %10, %cst_6 [1] : vector<8x128xf32> to vector<8xf32>
    %12 = vector.shape_cast %11 : vector<8xf32> to vector<8x1xf32>
    %13 = vector.broadcast %12 : vector<8x1xf32> to vector<8x128xf32>
    %14 = arith.divf %10, %13 : vector<8x128xf32>
    %c0_7 = arith.constant 0 : index
    %c0_8 = arith.constant 0 : index
    %15 = vector.load %arg4[%c0_7, %c0_8] : memref<8x128xf32, #tpu.memory_space<vmem>>, vector<8x128xf32>
    tpu.vector_store %arg4[%c0_7, %c0_8], %14 {strides = array<i32>} : memref<8x128xf32, #tpu.memory_space<vmem>>, vector<8x128xf32>,
    return
  }
  func.func @transform_0(%arg0: i32) -> (i32, i32) {
    %c0_i32 = arith.constant 0 : i32
    %c0_i32_0 = arith.constant 0 : i32
    return %arg0, %c0_i32 : i32, i32
  }
  func.func @transform_1(%arg0: i32) -> (i32, i32) {
    %c0_i32 = arith.constant 0 : i32
    %c0_i32_0 = arith.constant 0 : i32
    %c0_i32_1 = arith.constant 0 : i32
    return %c0_i32, %c0_i32_0 : i32, i32
  }
  func.func @transform_2(%arg0: i32) -> (i32, i32) {
    %c0_i32 = arith.constant 0 : i32
    %c0_i32_0 = arith.constant 0 : i32
    %c0_i32_1 = arith.constant 0 : i32
    return %c0_i32, %c0_i32_0 : i32, i32
  }
  func.func @transform_3(%arg0: i32) -> (i32, i32) {
    %c0_i32 = arith.constant 0 : i32
    %c0_i32_0 = arith.constant 0 : i32
    return %arg0, %c0_i32 : i32, i32
  }
}

</mosaic_0001>

<bundles_post_ra>
// kernel: _lambda_.2
= control target key start
LH: loop header
LB: loop body
LE: loop exit
PB: predicated region body
PF: predicated region fallthrough
CT: control target
= control target key end

     0   :  { %9 = vsyncpa [#allocation3], 0  ;;  %s3167_s0 = inlined_call_operand.hbm [shape: f32[16,128,64], index: 0, kind: input, shape index: {}]   ;;  %s3168_s1 = inlined_call_operand.hbm [shape: f32[32,128], index: 1, kind: input, shape index: {}]   ;;  %s3169_s2 = inlined_call_operand.hbm [shape: f32[32,1], index: 2, kind: input, shape index: {}]   ;;  %s3170_s3 = inlined_call_operand.hbm [shape: f32[32,1], index: 3, kind: input, shape index: {}]   ;;  %s3171_s4 = inlined_call_operand.hbm [shape: f32[16,32,64], index: 4, kind: output, shape index: {}]  }
   0x1   :  { %11 = vsyncpa [#allocation3 + $0x1], 0 }
   0x2   :  { %12 = vsyncpa [#allocation6], 0 }
   0x3   :  { %13 = vsyncpa [#allocation9], 0 }
   0x4   :  { %14 = vsyncpa [#allocation4], 0 }
   0x5   :  { %16 = vsyncpa [#allocation4 + $0x1], 0  ;;  %s2578_s15 = smov 0   ;;  %s2580_s16 = smov 0  }
   0x6   :  { %s2582_s17 = smov 0   ;;  %s2584_s18 = smov 0  }
   0x7 LB: > { %s2599_s19 = sadd.s32 4294967295, %s2541_s18   ;;  %s1383_s20 = sadd.s32 4294967294, %s2541_s18   ;;  %s2541_s18 = sphi %s2584_s18, %s3194_s18   ;;  %s2537_s17 = sphi %s2582_s17, %s3193_s17   ;;  %s2533_s16 = sphi %s2580_s16, %s3192_s16   ;;  %s2529_s15 = sphi %s2578_s15, %s3191_s15  }
   0x8   : > { %p42_p0 = scmp.ne.s32.totalorder %s2533_s16, %s2529_s15  ;;  %p3172_p1 = scmp.eq.s32.totalorder %s2599_s19, 0 }
   0x9   : > { %p135_p3 = scmp.eq.s32.totalorder %s1383_s20, 1  ;;  %p1384_p5 = scmp.ge.s32.totalorder %s2541_s18, 1 }
   0xa   : > { %p2608_p4 = por %p3172_p1, %p42_p0  ;;  %p142_p7 = scmp.lt.s32.totalorder %s2541_s18, 3 }
   0xb   : > { %p2613_p6 = por %p135_p3, %p42_p0  ;;  %s2543_s24 = smov [#allocation5]  }
   0xc   : > { %s3175_s21 = scalar_select %p2608_p4, 1, 0 }
   0xd   : > { %s3176_s22 = scalar_select %p2613_p6, 1, 0 }
   0xe   : > { %p2618_p8 = pnand %p1384_p5, %p142_p7  ;;  %s154_s25 = sshll.u32 %s2543_s24, 4  ;;  %s2622_s25 = int_to_ptr.vmem [resolvable:$true] %s154_s25 }
   0xf   : > { %s2544_s27 = smov [#allocation7]   ;;  %s2545_s29 = smov [#allocation8]  }
  0x10   : > { %s3177_s23 = scalar_select %p2618_p8, 1, 0 }
  0x11   : > { %p2285_p9 = pneg %p2618_p8  ;;  %s167_s28 = sshll.u32 %s2544_s27, 4  ;;  %s2633_s28 = int_to_ptr.vmem [resolvable:$true] %s167_s28 }
  0x12   : > { %s2635_s30 = sshll.u32 %s2545_s29, 4  ;;  %s2353_s7 = scalar_lea.hbm %s3168_s1, 512  ;;  %s181_s30 = int_to_ptr.vmem [resolvable:$true] %s2635_s30 }
  0x13   : > { %p2629_p11 = pnand %p2285_p9, %p3172_p1  ;;  %p2354_p12 = scmp.ne.s32.totalorder %s3168_s1, %s2353_s7 }
  0x14   : > { %p2360_p5 = scmp.lt.u32.totalorder %s2353_s7, %s3168_s1 }
  0x15   : > { %p2645_p13 = pneg %p2629_p11 }
  0x17   : > { %p2356_p0 = pnand %p2645_p13, %p2354_p12 }
  0x19   : > { %p2357_p3 = pneg %p2356_p0 }
  0x1b   : > { %p2362_p7 = pnand %p2360_p5, %p2357_p3 }
  0x1d   : > { %2365 = shalt.err (!%p2362_p7)
}
  0x1e   : > { %s2366_s13 = scalar_lea.vmem %s2622_s25, 512  ;;  %p2374_p2 = scmp.lt.s32.totalorder %s2622_s25, %s2622_s25 }
  0x1f   : > { %p2367_p9 = scmp.ne.s32.totalorder %s2622_s25, %s2366_s13  ;;  %p2375_p6 = scmp.lt.s32.totalorder %s2366_s13, %s2366_s13 }
  0x21   : > { %p2369_p10 = pnand %p2367_p9, %p2645_p13  ;;  %p2376_p12 = por %p2375_p6, %p2374_p2 }
  0x23   : > { %p2370_p1 = pneg %p2369_p10 }
  0x25   : > { %p2377_p0 = pnand %p2376_p12, %p2370_p1 }
  0x27   : > { %2380 = shalt.err (!%p2377_p0)
}
  0x28   : > { %s2546_s14 = smov 128   ;;  %s2547_s20 = smov 8  }
  0x29   : > { %2288 = dma.hbm_to_vmem [thread:$0]  (!%p2629_p11), %s3168_s1, 512, %s2622_s25, [#allocation6], %s2546_s14, %s2546_s14, %s2547_s20  }
  0x2a   : > { %s2381_s6 = scalar_lea.hbm %s3169_s2, 512 }
  0x2b   : > { %p2382_p1 = scmp.ne.s32.totalorder %s3169_s2, %s2381_s6  ;;  %p2388_p10 = scmp.lt.u32.totalorder %s2381_s6, %s3169_s2 }
  0x2d   : > { %p2384_p2 = pnand %p2382_p1, %p2645_p13 }
  0x2f   : > { %p2385_p6 = pneg %p2384_p2 }
  0x31   : > { %p2390_p3 = pnand %p2388_p10, %p2385_p6 }
  0x33   : > { %2393 = shalt.err (!%p2390_p3)
}
  0x34   : > { %s2394_s25 = scalar_lea.vmem %s2633_s28, 512  ;;  %p2402_p12 = scmp.lt.s32.totalorder %s2633_s28, %s2633_s28 }
  0x35   : > { %p2395_p5 = scmp.ne.s32.totalorder %s2633_s28, %s2394_s25  ;;  %p2403_p0 = scmp.lt.s32.totalorder %s2394_s25, %s2394_s25 }
  0x37   : > { %p2397_p7 = pnand %p2395_p5, %p2645_p13  ;;  %p2404_p1 = por %p2403_p0, %p2402_p12 }
  0x39   : > { %p2398_p9 = pneg %p2397_p7 }
  0x3b   : > { %p2405_p2 = pnand %p2404_p1, %p2398_p9 }
  0x3d   : > { %2408 = shalt.err (!%p2405_p2)
}
  0x3e   : > { %2291 = dma.hbm_to_vmem [thread:$0]  (!%p2629_p11), %s3169_s2, 512, %s2633_s28, [#allocation6], %s2546_s14, %s2546_s14, %s2547_s20  }
  0x3f   : > { %s2409_s29 = scalar_lea.hbm %s3170_s3, 512 }
  0x40   : > { %p2410_p6 = scmp.ne.s32.totalorder %s3170_s3, %s2409_s29  ;;  %p2416_p5 = scmp.lt.u32.totalorder %s2409_s29, %s3170_s3 }
  0x42   : > { %p2412_p10 = pnand %p2410_p6, %p2645_p13 }
  0x44   : > { %p2413_p3 = pneg %p2412_p10 }
  0x46   : > { %p2418_p7 = pnand %p2416_p5, %p2413_p3 }
  0x48   : > { %2421 = shalt.err (!%p2418_p7)
}
  0x49   : > { %s2422_s9 = scalar_lea.vmem %s181_s30, 512  ;;  %p2430_p1 = scmp.lt.s32.totalorder %s181_s30, %s181_s30 }
  0x4a   : > { %p2423_p9 = scmp.ne.s32.totalorder %s181_s30, %s2422_s9  ;;  %p2431_p2 = scmp.lt.s32.totalorder %s2422_s9, %s2422_s9 }
  0x4c   : > { %p2425_p12 = pnand %p2423_p9, %p2645_p13  ;;  %p2432_p4 = por %p2431_p2, %p2430_p1 }
  0x4e   : > { %p2426_p0 = pneg %p2425_p12 }
  0x50   : > { %p2433_p8 = pnand %p2432_p4, %p2426_p0 }
  0x52   : > { %2436 = shalt.err (!%p2433_p8)
}
  0x53   : > { %2294 = dma.hbm_to_vmem [thread:$0]  (!%p2629_p11), %s3170_s3, 512, %s181_s30, [#allocation9], %s2546_s14, %s2546_s14, %s2547_s20  }
  0x54   : > { %s2718_s10 = sadd.s32 1, %s2541_s18   ;;  %s29_s25 = sadd.s32 1, %s2537_s17 }
  0x55   : > { %s26_s26 = ssub.s32 %s2541_s18, %s2718_s10  ;;  %p36_p8 = scmp.ne.s32.totalorder %s2537_s17, %s2533_s16 }
  0x56   : > { %p27_p4 = scmp.eq.s32.totalorder %s26_s26, 0  ;;  %p37_p13 = scmp.eq.s32.totalorder %s2541_s18, 0 }
  0x57   : > { %p2306_p6 = scmp.lt.s32.totalorder %s2541_s18, 2  ;;  %p3180_p3 = scmp.eq.s32.totalorder %s2599_s19, 1 }
  0x58   : > { %s2728_s12 = scalar_select %p27_p4, %s2537_s17, %s29_s25  }
  0x59   : > { %p38_p10 = por %p37_p13, %p36_p8  ;;  %p2732_p5 = por %p3180_p3, %p36_p8 }
  0x5a   : > { %s194_s24 = sand.u32 1, %s2537_s17   ;;  %s1546_s27 = sshll.u32 %s2541_s18, 14 }
  0x5b   : > { %s1389_s30 = sshll.u32 %s194_s24, 10  ;;  %s2741_s6 = scalar_lea.hbm %s3167_s0, %s1546_s27 }
  0x5c   : > { %s198_s7 = scalar_lea.vmem [#allocation2], %s1389_s30  ;;  %p2743_p11 = pnand %p2306_p6, %p38_p10 }
  0x5d   : > { %s206_s8 = sshll.u32 %s198_s7, 4  ;;  %s2749_s28 = scalar_lea.sflag [#allocation3], %s194_s24  ;;  %s2747_s8 = int_to_ptr.vmem [resolvable:$true] %s206_s8 }
  0x5e   : > { %s2437_s11 = scalar_lea.hbm %s2741_s6, 16384  ;;  %p2439_p9 = pneg %p2743_p11 }
  0x5f   : > { %p2438_p7 = scmp.ne.s32.totalorder %s2741_s6, %s2437_s11  ;;  %s2442_s27 = scalar_lea.hbm %s3167_s0, 32768 }
  0x60   : > { %p2443_p1 = scmp.lt.u32.totalorder %s2741_s6, %s3167_s0  ;;  %p2444_p2 = scmp.lt.u32.totalorder %s2442_s27, %s2437_s11 }
  0x61   : > { %p2440_p12 = pnand %p2439_p9, %p2438_p7  ;;  %p2446_p8 = scmp.lt.u32.totalorder %s2437_s11, %s2741_s6 }
  0x62   : > { %p2445_p4 = por %p2444_p2, %p2443_p1 }
  0x63   : > { %p2441_p0 = pneg %p2440_p12 }
  0x64   : > { %p2447_p13 = por %p2446_p8, %p2445_p4 }
  0x66   : > { %p2448_p6 = pnand %p2447_p13, %p2441_p0 }
  0x68   : > { %2451 = shalt.err (!%p2448_p6)
}
  0x69   : > { %s2452_s24 = scalar_lea.vmem %s2747_s8, 16384  ;;  %s2548_s5 = smov [#allocation2]  }
  0x6a   : > { %p2453_p10 = scmp.ne.s32.totalorder %s2747_s8, %s2452_s24  ;;  %s2457_s7 = sshll.u32 %s2548_s5, 4  ;;  %s2458_s7 = int_to_ptr.vmem [resolvable:$false] %s2457_s7 }
  0x6b   : > { %s2459_s26 = scalar_lea.vmem %s2458_s7, 32768  ;;  %p2460_p12 = scmp.lt.s32.totalorder %s2747_s8, %s2458_s7 }
  0x6c   : > { %p2455_p3 = pnand %p2453_p10, %p2439_p9  ;;  %p2461_p1 = scmp.lt.s32.totalorder %s2459_s26, %s2452_s24 }
  0x6e   : > { %p2456_p7 = pneg %p2455_p3  ;;  %p2462_p2 = por %p2461_p1, %p2460_p12 }
  0x70   : > { %p2463_p4 = pnand %p2462_p2, %p2456_p7 }
  0x72   : > { %2466 = shalt.err (!%p2463_p4)
}
  0x73   : > { %2298 = dma.hbm_to_vmem [thread:$0]  (!%p2743_p11), %s2741_s6, 16384, %s2747_s8, %s2749_s28, %s2546_s14, %s2546_s14, %s2547_s20  }
  0x74   : > { %p3183_p9 = scmp.ne.s32.totalorder %s3177_s23, 0 }
  0x75   : > { %s2783_s11 = sand.u32 (!%p3183_p9), 1, %s2533_s16   ;;  %p3184_p0 = scmp.ne.s32.totalorder (!%p3183_p9), %s3175_s21, 0 }
  0x76   : > { %218 = sbr.rel (%p3183_p9) target bundleno = 503 (0x1f7), region = 36  ;;  %s1394_s25 = sshll.u32 (!%p3183_p9), %s2783_s11, 10 }
  0x77   : > { %s221_s27 = scalar_lea.sflag (!%p3183_p9), [#allocation3], %s2783_s11  ;;  %s2787_s30 = scalar_lea.vmem (!%p3183_p9), [#allocation2], %s1394_s25 }
  0x7d   : > { %2512 = dma.done.wait (%p3184_p0), %s221_s27, 16384  }
  0x7e   : > { %2514 = vsyncadd (%p3184_p0), %s221_s27, 4294950912  ;;  %p3185_p11 = scmp.eq.s32.totalorder %s2599_s19, 0 }
  0x80   : > { %2516 = dma.done.wait (%p3185_p11), [#allocation6], 1024   ;;  %p3186_p8 = pmov %p3185_p11 }
  0x82   : > { %2518 = vsyncadd (%p3186_p8), [#allocation6], 4294966272  ;;  %p3187_p13 = pmov %p3186_p8 }
  0x83   : > { %p3188_p6 = pmov %p3186_p8 }
  0x84   : > { %2520 = dma.done.wait (%p3187_p13), [#allocation9], 512  }
  0x85   : > { %2522 = vsyncadd (%p3188_p6), [#allocation9], 4294966784  ;;  %v2549_v0 = vmov 0   ;;  %v275_v1 = vld [vmem:[%s2787_s30] sm:$0xff]  ;;  %v276_v2 = vld [vmem:[%s2787_s30 + $0x8] sm:$0xff]  ;;  %s1398_s21 = sshll.u32 %s2783_s11, 8 }
  0x86   : > { %2352 = vset.pattern.permute.xlu1 %v2549_v0  ;;  %2351 = vset.pattern.permute.xlu0 %v2549_v0  ;;  %v1399_v3 = vld [vmem:[%s2787_s30 + $0x80] sm:$0xff]  ;;  %v2013_v4 = vpack.c.bf16 %v276_v2, %v275_v1  ;;  %v1400_v5 = vld [vmem:[%s2787_s30 + $0x88] sm:$0xff]  ;;  %v277_v6 = vld [vmem:[%s2787_s30 + $0x10] sm:$0xff]  ;;  %vm428_vm0 = vcmask 523264   ;;  %s2997_s23 = scalar_lea.vmem [#allocation10], %s1398_s21  ;;  %s1548_s14 = sshll.u32 %s2599_s19, 12 }
  0x87   : > { %v278_v7 = vld [vmem:[%s2787_s30 + $0x18] sm:$0xff]  ;;  %v2045_v8 = vpack.c.bf16 %v1400_v5, %v1399_v3  ;;  %v1401_v10 = vld [vmem:[%s2787_s30 + $0x90] sm:$0xff]  ;;  %v279_v12 = vld [vmem:[%s2787_s30 + $0x20] sm:$0xff]  ;;  %s1281_s20 = sshll.u32 %s2997_s23, 4  ;;  %s3113_s8 = scalar_lea.hbm %s3171_s4, %s1548_s14  ;;  %s3115_s20 = int_to_ptr.vmem [resolvable:$true] %s1281_s20 }
  0x88   : > { %v2017_v9 = vpack.c.bf16 %v278_v7, %v277_v6  ;;  %v1402_v11 = vld [vmem:[%s2787_s30 + $0x98] sm:$0xff]  ;;  %2014 = vmatprep.subr.bf16.mxu0 %v2013_v4  ;;  %v280_v14 = vld [vmem:[%s2787_s30 + $0x28] sm:$0xff]  ;;  %v1403_v15 = vld [vmem:[%s2787_s30 + $0xa0] sm:$0xff]  ;;  %s1267_s9 = scalar_lea.sflag [#allocation4], %s2783_s11  ;;  %s2467_s28 = scalar_lea.vmem %s3115_s20, 4096 }
  0x89   : > { %v2049_v13 = vpack.c.bf16 %v1402_v11, %v1401_v10  ;;  %v1404_v16 = vld [vmem:[%s2787_s30 + $0xa8] sm:$0xff]  ;;  %2046 = vmatprep.subr.bf16.mxu1 %v2045_v8  ;;  %2016 = vmatpush3.bf16.msra.mxu0 %v2013_v4  ;;  %v2021_v17 = vpack.c.bf16 %v280_v14, %v279_v12  ;;  %v281_v19 = vld [vmem:[%s2787_s30 + $0x30] sm:$0xff]  ;;  %v282_v20 = vld [vmem:[%s2787_s30 + $0x38] sm:$0xff]  ;;  %p2468_p10 = scmp.ne.s32.totalorder %s3115_s20, %s2467_s28  ;;  %s2550_s29 = smov [#allocation10]  }
  0x8a   : > { %2048 = vmatpush3.bf16.msra.mxu1 %v2045_v8  ;;  %2018 = vmatprep.subr.bf16.mxu0 %v2017_v9  ;;  %v2053_v18 = vpack.c.bf16 %v1404_v16, %v1403_v15  ;;  %v1405_v21 = vld [vmem:[%s2787_s30 + $0xb0] sm:$0xff]  ;;  %v1406_v22 = vld [vmem:[%s2787_s30 + $0xb8] sm:$0xff]  ;;  %v2025_v23 = vpack.c.bf16 %v282_v20, %v281_v19  ;;  %v283_v25 = vld [vmem:[%s2787_s30 + $0x40] sm:$0xff]  ;;  %s2471_s24 = sshll.u32 %s2550_s29, 4  ;;  %s2472_s24 = int_to_ptr.vmem [resolvable:$false] %s2471_s24 }
  0x8b   : > { %2050 = vmatprep.subr.bf16.mxu1 %v2049_v13  ;;  %v2057_v24 = vpack.c.bf16 %v1406_v22, %v1405_v21  ;;  %v284_v26 = vld [vmem:[%s2787_s30 + $0x48] sm:$0xff]  ;;  %v2819_v27 = vld [vmem:[#allocation5] sm:$0xff]  ;;  %v285_v32 = vld [vmem:[%s2787_s30 + $0x50] sm:$0xff]  ;;  %p2469_p3 = pnand %p2468_p10, %p2732_p5  ;;  %s2473_s5 = scalar_lea.vmem %s2472_s24, 8192 }
  0x8c   : > { %v1407_v28 = vld [vmem:[%s2787_s30 + $0xc0] sm:$0xff]  ;;  %v1408_v29 = vld [vmem:[%s2787_s30 + $0xc8] sm:$0xff]  ;;  %1741 = vmatprep.mubr.f32.mxu0 %v2819_v27  ;;  %1779 = vmatprep.mubr.f32.mxu1 %v2819_v27  ;;  %v2029_v30 = vpack.c.bf16 %v284_v26, %v283_v25  ;;  %v286_v33 = vld [vmem:[%s2787_s30 + $0x58] sm:$0xff]  ;;  %p2474_p12 = scmp.lt.s32.totalorder %s3115_s20, %s2472_s24  ;;  %p2475_p1 = scmp.lt.s32.totalorder %s2473_s5, %s2467_s28 }
  0x8d   : > { %2020 = vmatpush3.bf16.msra.mxu0 %v2017_v9  ;;  %v2061_v31 = vpack.c.bf16 %v1408_v29, %v1407_v28  ;;  %v1409_v34 = vld [vmem:[%s2787_s30 + $0xd0] sm:$0xff]  ;;  %v1410_v35 = vld [vmem:[%s2787_s30 + $0xd8] sm:$0xff]  ;;  %v2033_v36 = vpack.c.bf16 %v286_v33, %v285_v32  ;;  %v287_v38 = vld [vmem:[%s2787_s30 + $0x60] sm:$0xff]  ;;  %p2470_p7 = pneg %p2469_p3 }
  0x8e   : > { %2052 = vmatpush3.bf16.msra.mxu1 %v2049_v13  ;;  %2022 = vmatprep.subr.bf16.mxu0 %v2021_v17  ;;  %v2065_v37 = vpack.c.bf16 %v1410_v35, %v1409_v34  ;;  %v288_v39 = vld [vmem:[%s2787_s30 + $0x68] sm:$0xff]  ;;  %v1411_v40 = vld [vmem:[%s2787_s30 + $0xe0] sm:$0xff]  ;;  %v289_v44 = vld [vmem:[%s2787_s30 + $0x70] sm:$0xff]  ;;  %p2476_p2 = por %p2475_p1, %p2474_p12 }
  0x8f   : > { %2054 = vmatprep.subr.bf16.mxu1 %v2053_v18  ;;  %v1412_v41 = vld [vmem:[%s2787_s30 + $0xe8] sm:$0xff]  ;;  %v2037_v42 = vpack.c.bf16 %v288_v39, %v287_v38  ;;  %v290_v45 = vld [vmem:[%s2787_s30 + $0x78] sm:$0xff]  ;;  %v1413_v46 = vld [vmem:[%s2787_s30 + $0xf0] sm:$0xff] }
  0x90   : > { %v2069_v43 = vpack.c.bf16 %v1412_v41, %v1411_v40  ;;  %v1414_v47 = vld [vmem:[%s2787_s30 + $0xf8] sm:$0xff]  ;;  %v2041_v48 = vpack.c.bf16 %v290_v45, %v289_v44  ;;  %v1419_v50 = vld [vmem:[%s2787_s30 + $0x100] sm:$0xff]  ;;  %v1420_v51 = vld [vmem:[%s2787_s30 + $0x108] sm:$0xff]  ;;  %p2477_p4 = pnand %p2476_p2, %p2470_p7 }
  0x91   : > { %2024 = vmatpush3.bf16.msra.mxu0 %v2021_v17  ;;  %v2073_v49 = vpack.c.bf16 %v1414_v47, %v1413_v46  ;;  %v1439_v52 = vld [vmem:[%s2787_s30 + $0x180] sm:$0xff]  ;;  %v1440_v53 = vld [vmem:[%s2787_s30 + $0x188] sm:$0xff]  ;;  %v2077_v54 = vpack.c.bf16 %v1420_v51, %v1419_v50  ;;  %v1421_v56 = vld [vmem:[%s2787_s30 + $0x110] sm:$0xff] }
  0x92   : > { %2056 = vmatpush3.bf16.msra.mxu1 %v2053_v18  ;;  %2026 = vmatprep.subr.bf16.mxu0 %v2025_v23  ;;  %v2109_v55 = vpack.c.bf16 %v1440_v53, %v1439_v52  ;;  %v1422_v57 = vld [vmem:[%s2787_s30 + $0x118] sm:$0xff]  ;;  %v1441_v58 = vld [vmem:[%s2787_s30 + $0x190] sm:$0xff]  ;;  %v2845_v60 = vld [vmem:[#allocation5 + $0x8] sm:$0xff] }
  0x93   : > { %2058 = vmatprep.subr.bf16.mxu1 %v2057_v24  ;;  %v1442_v59 = vld [vmem:[%s2787_s30 + $0x198] sm:$0xff]  ;;  %v2081_v61 = vpack.c.bf16 %v1422_v57, %v1421_v56  ;;  %v1423_v63 = vld [vmem:[%s2787_s30 + $0x120] sm:$0xff]  ;;  %v1424_v0 = vld [vmem:[%s2787_s30 + $0x128] sm:$0xff] }
  0x94   : > { %v2113_v62 = vpack.c.bf16 %v1442_v59, %v1441_v58  ;;  %v1443_v1 = vld [vmem:[%s2787_s30 + $0x1a0] sm:$0xff]  ;;  %v1444_v2 = vld [vmem:[%s2787_s30 + $0x1a8] sm:$0xff]  ;;  %v2852_v3 = vld [vmem:[#allocation5 + $0x10] sm:$0xff]  ;;  %v2085_v5 = vpack.c.bf16 %v1424_v0, %v1423_v63 }
  0x95   : > { %2028 = vmatpush3.bf16.msra.mxu0 %v2025_v23  ;;  %v2855_v4 = vld [vmem:[#allocation5 + $0x18] sm:$0xff]  ;;  %v2117_v6 = vpack.c.bf16 %v1444_v2, %v1443_v1  ;;  %v1425_v7 = vld [vmem:[%s2787_s30 + $0x130] sm:$0xff]  ;;  %v267_v13 = vld [vmem:[#allocation7] sm:$0xff] }
  0x96   : > { %2060 = vmatpush3.bf16.msra.mxu1 %v2057_v24  ;;  %2030 = vmatprep.subr.bf16.mxu0 %v2029_v30  ;;  %v1426_v8 = vld [vmem:[%s2787_s30 + $0x138] sm:$0xff]  ;;  %v1445_v9 = vld [vmem:[%s2787_s30 + $0x1b0] sm:$0xff]  ;;  %v1427_v15 = vld [vmem:[%s2787_s30 + $0x140] sm:$0xff] }
  0x97   : > { %2062 = vmatprep.subr.bf16.mxu1 %v2061_v31  ;;  %v1446_v10 = vld [vmem:[%s2787_s30 + $0x1b8] sm:$0xff]  ;;  %v269_v11 = vld [vmem:[#allocation7 + $0x10] sm:$0xff]  ;;  %v2089_v12 = vpack.c.bf16 %v1426_v8, %v1425_v7  ;;  %v1428_v16 = vld [vmem:[%s2787_s30 + $0x148] sm:$0xff]  ;;  %378 = vperm.xlu0 %2351, %v267_v13  }
  0x98   : > { %v2121_v14 = vpack.c.bf16 %v1446_v10, %v1445_v9  ;;  %v1447_v17 = vld [vmem:[%s2787_s30 + $0x1c0] sm:$0xff]  ;;  %v1448_v18 = vld [vmem:[%s2787_s30 + $0x1c8] sm:$0xff]  ;;  %388 = vperm.xlu1 %2352, %v269_v11   ;;  %v270_v19 = vld [vmem:[#allocation7 + $0x18] sm:$0xff]  ;;  %v2093_v20 = vpack.c.bf16 %v1428_v16, %v1427_v15 }
  0x99   : > { %2032 = vmatpush3.bf16.msra.mxu0 %v2029_v30  ;;  %v268_v21 = vld [vmem:[#allocation7 + $0x8] sm:$0xff]  ;;  %v2125_v22 = vpack.c.bf16 %v1448_v18, %v1447_v17  ;;  %v1429_v23 = vld [vmem:[%s2787_s30 + $0x150] sm:$0xff]  ;;  %v1430_v24 = vld [vmem:[%s2787_s30 + $0x158] sm:$0xff] }
  0x9a   : > { %2064 = vmatpush3.bf16.msra.mxu1 %v2061_v31  ;;  %2034 = vmatprep.subr.bf16.mxu0 %v2033_v36  ;;  %v1449_v25 = vld [vmem:[%s2787_s30 + $0x1d0] sm:$0xff]  ;;  %v1450_v26 = vld [vmem:[%s2787_s30 + $0x1d8] sm:$0xff]  ;;  %v272_v28 = vld [vmem:[#allocation8 + $0x8] sm:$0xff]  ;;  %v2097_v29 = vpack.c.bf16 %v1430_v24, %v1429_v23 }
  0x9b   : > { %2066 = vmatprep.subr.bf16.mxu1 %v2065_v37  ;;  %383 = vperm.xlu0 %2351, %v268_v21   ;;  %v271_v30 = vld [vmem:[#allocation8] sm:$0xff]  ;;  %v2129_v31 = vpack.c.bf16 %v1450_v26, %v1449_v25  ;;  %v1432_v33 = vld [vmem:[%s2787_s30 + $0x168] sm:$0xff]  ;;  %v273_v38 = vld [vmem:[#allocation8 + $0x10] sm:$0xff] }
  0x9c   : > { %393 = vperm.xlu1 %2352, %v270_v19   ;;  %v1431_v32 = vld [vmem:[%s2787_s30 + $0x160] sm:$0xff]  ;;  %v1452_v35 = vld [vmem:[%s2787_s30 + $0x1e8] sm:$0xff]  ;;  %v1433_v40 = vld [vmem:[%s2787_s30 + $0x170] sm:$0xff] }
  0x9d   : > { %2036 = vmatpush3.bf16.msra.mxu0 %v2033_v36  ;;  %v1451_v34 = vld [vmem:[%s2787_s30 + $0x1e0] sm:$0xff]  ;;  %v274_v36 = vld [vmem:[#allocation8 + $0x18] sm:$0xff]  ;;  %v1460_v47 = vld [vmem:[%s2787_s30 + $0x208] sm:$0xff] }
  0x9e   : > { %2068 = vmatpush3.bf16.msra.mxu1 %v2065_v37  ;;  %2038 = vmatprep.subr.bf16.mxu0 %v2037_v42  ;;  %v2101_v37 = vpack.c.bf16 %v1432_v33, %v1431_v32  ;;  %v2133_v39 = vpack.c.bf16 %v1452_v35, %v1451_v34  ;;  %v1434_v41 = vld [vmem:[%s2787_s30 + $0x178] sm:$0xff]  ;;  %v1459_v46 = vld [vmem:[%s2787_s30 + $0x200] sm:$0xff]  ;;  %v1461_v52 = vld [vmem:[%s2787_s30 + $0x210] sm:$0xff] }
  0x9f   : > { %2070 = vmatprep.subr.bf16.mxu1 %v2069_v43  ;;  %402 = vperm.xlu0 %2351, %v271_v30   ;;  %v2105_v44 = vpack.c.bf16 %v1434_v41, %v1433_v40  ;;  %v2141_v50 = vpack.c.bf16 %v1460_v47, %v1459_v46  ;;  %v1462_v53 = vld [vmem:[%s2787_s30 + $0x218] sm:$0xff]  ;;  %v1463_v58 = vld [vmem:[%s2787_s30 + $0x220] sm:$0xff]  ;;  %v1464_v59 = vld [vmem:[%s2787_s30 + $0x228] sm:$0xff] }
  0xa0   : > { %407 = vperm.xlu1 %2352, %v272_v28   ;;  %v2145_v56 = vpack.c.bf16 %v1462_v53, %v1461_v52  ;;  %v2149_v63 = vpack.c.bf16 %v1464_v59, %v1463_v58  ;;  %v1465_v1 = vld [vmem:[%s2787_s30 + $0x230] sm:$0xff]  ;;  %v1466_v2 = vld [vmem:[%s2787_s30 + $0x238] sm:$0xff]  ;;  %v1467_v9 = vld [vmem:[%s2787_s30 + $0x240] sm:$0xff] }
  0xa1   : > { %2040 = vmatpush3.bf16.msra.mxu0 %v2037_v42  ;;  %v1453_v42 = vld [vmem:[%s2787_s30 + $0x1f0] sm:$0xff]  ;;  %v2153_v7 = vpack.c.bf16 %v1466_v2, %v1465_v1  ;;  %v1468_v10 = vld [vmem:[%s2787_s30 + $0x248] sm:$0xff]  ;;  %v1487_v11 = vld [vmem:[%s2787_s30 + $0x2c0] sm:$0xff] }
  0xa2   : > { %2072 = vmatpush3.bf16.msra.mxu1 %v2069_v43  ;;  %2042 = vmatprep.subr.bf16.mxu0 %v2041_v48  ;;  %v1454_v43 = vld [vmem:[%s2787_s30 + $0x1f8] sm:$0xff]  ;;  %v2157_v13 = vpack.c.bf16 %v1468_v10, %v1467_v9  ;;  %v1469_v15 = vld [vmem:[%s2787_s30 + $0x250] sm:$0xff]  ;;  %v1471_v21 = vld [vmem:[%s2787_s30 + $0x260] sm:$0xff] }
  0xa3   : > { %2074 = vmatprep.subr.bf16.mxu1 %v2073_v49  ;;  %412 = vperm.xlu0 %2351, %v273_v38   ;;  %v2137_v45 = vpack.c.bf16 %v1454_v43, %v1453_v42  ;;  %v1470_v16 = vld [vmem:[%s2787_s30 + $0x258] sm:$0xff]  ;;  %v1489_v17 = vld [vmem:[%s2787_s30 + $0x2d0] sm:$0xff]  ;;  %v1491_v23 = vld [vmem:[%s2787_s30 + $0x2e0] sm:$0xff] }
  0xa4   : > { %417 = vperm.xlu1 %2352, %v274_v36   ;;  %v1490_v18 = vld [vmem:[%s2787_s30 + $0x2d8] sm:$0xff]  ;;  %v2161_v19 = vpack.c.bf16 %v1470_v16, %v1469_v15  ;;  %v1492_v24 = vld [vmem:[%s2787_s30 + $0x2e8] sm:$0xff]  ;;  %v1473_v28 = vld [vmem:[%s2787_s30 + $0x270] sm:$0xff] }
  0xa5   : > { %2044 = vmatpush3.bf16.msra.mxu0 %v2041_v48  ;;  %v1479_v48 = vld [vmem:[%s2787_s30 + $0x280] sm:$0xff]  ;;  %v2197_v26 = vpack.c.bf16 %v1492_v24, %v1491_v23  ;;  %v1493_v30 = vld [vmem:[%s2787_s30 + $0x2f0] sm:$0xff]  ;;  %v1500_v35 = vld [vmem:[%s2787_s30 + $0x308] sm:$0xff] }
  0xa6   : > { %2076 = vmatpush3.bf16.msra.mxu1 %v2073_v49  ;;  %2078 = vmatprep.subr.bf16.mxu0 %v2077_v54  ;;  %v1480_v49 = vld [vmem:[%s2787_s30 + $0x288] sm:$0xff]  ;;  %v1499_v34 = vld [vmem:[%s2787_s30 + $0x300] sm:$0xff]  ;;  %v1501_v40 = vld [vmem:[%s2787_s30 + $0x310] sm:$0xff] }
  0xa7   : > { %2110 = vmatprep.subr.bf16.mxu1 %v2109_v55  ;;  %v2173_v51 = vpack.c.bf16 %v1480_v49, %v1479_v48  ;;  %v1519_v36 = vld [vmem:[%s2787_s30 + $0x380] sm:$0xff]  ;;  %v2205_v38 = vpack.c.bf16 %v1500_v35, %v1499_v34  ;;  %v1502_v41 = vld [vmem:[%s2787_s30 + $0x318] sm:$0xff]  ;;  %v1521_v42 = vld [vmem:[%s2787_s30 + $0x390] sm:$0xff] }
  0xa8   : > { %1742 = vmatmul.mubr.f32.vlgmr.msra.gmra.mrb[0].mxu0 %v2845_v60  ;;  %v1522_v43 = vld [vmem:[%s2787_s30 + $0x398] sm:$0xff]  ;;  %v1503_v46 = vld [vmem:[%s2787_s30 + $0x320] sm:$0xff]  ;;  %v1504_v47 = vld [vmem:[%s2787_s30 + $0x328] sm:$0xff] }
  0xa9   : > { %1780 = vmatmul.mubr.f32.vlgmr.msra.gmra.mrb[0].mxu1 %v2845_v60  ;;  %2080 = vmatpush3.bf16.msra.mxu0 %v2077_v54  ;;  %v1481_v54 = vld [vmem:[%s2787_s30 + $0x290] sm:$0xff]  ;;  %v1523_v48 = vld [vmem:[%s2787_s30 + $0x3a0] sm:$0xff]  ;;  %v1524_v49 = vld [vmem:[%s2787_s30 + $0x3a8] sm:$0xff] }
  0xaa   : > { %2112 = vmatpush3.bf16.msra.mxu1 %v2109_v55  ;;  %2082 = vmatprep.subr.bf16.mxu0 %v2081_v61  ;;  %v1482_v55 = vld [vmem:[%s2787_s30 + $0x298] sm:$0xff]  ;;  %v1505_v52 = vld [vmem:[%s2787_s30 + $0x330] sm:$0xff]  ;;  %v1507_v58 = vld [vmem:[%s2787_s30 + $0x340] sm:$0xff] }
  0xab   : > { %2114 = vmatprep.subr.bf16.mxu1 %v2113_v62  ;;  %1744 = vmatprep.mubr.f32.mxu0 %v2852_v3  ;;  %v2177_v57 = vpack.c.bf16 %v1482_v55, %v1481_v54  ;;  %v1506_v53 = vld [vmem:[%s2787_s30 + $0x338] sm:$0xff]  ;;  %v1525_v54 = vld [vmem:[%s2787_s30 + $0x3b0] sm:$0xff]  ;;  %v1508_v59 = vld [vmem:[%s2787_s30 + $0x348] sm:$0xff] }
  0xac   : > { %1782 = vmatprep.mubr.f32.mxu1 %v2852_v3  ;;  %1745 = vmatmul.mubr.f32.gmra.mrb[2].mxu0 %v2855_v4  ;;  %v1526_v55 = vld [vmem:[%s2787_s30 + $0x3b8] sm:$0xff]  ;;  %v1509_v1 = vld [vmem:[%s2787_s30 + $0x350] sm:$0xff]  ;;  %v1512_v9 = vld [vmem:[%s2787_s30 + $0x368] sm:$0xff] }
  0xad   : > { %2084 = vmatpush3.bf16.msra.mxu0 %v2081_v61  ;;  %1783 = vmatmul.mubr.f32.gmra.mrb[2].mxu1 %v2855_v4  ;;  %v1483_v61 = vld [vmem:[%s2787_s30 + $0x2a0] sm:$0xff]  ;;  %v1510_v2 = vld [vmem:[%s2787_s30 + $0x358] sm:$0xff]  ;;  %v1533_v16 = vld [vmem:[%s2787_s30 + $0x3f0] sm:$0xff] }
  0xae   : > { %2116 = vmatpush3.bf16.msra.mxu1 %v2113_v62  ;;  %2086 = vmatprep.subr.bf16.mxu0 %v2085_v5  ;;  %v1484_v62 = vld [vmem:[%s2787_s30 + $0x2a8] sm:$0xff]  ;;  %v1531_v10 = vld [vmem:[%s2787_s30 + $0x3e0] sm:$0xff]  ;;  %v1514_v15 = vld [vmem:[%s2787_s30 + $0x378] sm:$0xff] }
  0xaf   : > { %2118 = vmatprep.subr.bf16.mxu1 %v2117_v6  ;;  %1817 = vmatprep.mubr.f32.mxu0 %v2819_v27  ;;  %v2181_v0 = vpack.c.bf16 %v1484_v62, %v1483_v61  ;;  %v1527_v61 = vld [vmem:[%s2787_s30 + $0x3c0] sm:$0xff]  ;;  %v1528_v62 = vld [vmem:[%s2787_s30 + $0x3c8] sm:$0xff] }
  0xb0   : > { %1855 = vmatprep.mubr.f32.mxu1 %v2819_v27 }
  0xb1   : > { %2088 = vmatpush3.bf16.msra.mxu0 %v2085_v5  ;;  %v1485_v5 = vld [vmem:[%s2787_s30 + $0x2b0] sm:$0xff] }
  0xb2   : > { %2120 = vmatpush3.bf16.msra.mxu1 %v2117_v6  ;;  %2090 = vmatprep.subr.bf16.mxu0 %v2089_v12  ;;  %v1486_v6 = vld [vmem:[%s2787_s30 + $0x2b8] sm:$0xff] }
  0xb3   : > { %2122 = vmatprep.subr.bf16.mxu1 %v2121_v14  ;;  %v2185_v8 = vpack.c.bf16 %v1486_v6, %v1485_v5  ;;  %v1529_v5 = vld [vmem:[%s2787_s30 + $0x3d0] sm:$0xff]  ;;  %v1530_v6 = vld [vmem:[%s2787_s30 + $0x3d8] sm:$0xff] }
  0xb5   : > { %2092 = vmatpush3.bf16.msra.mxu0 %v2089_v12  ;;  %v1488_v12 = vld [vmem:[%s2787_s30 + $0x2c8] sm:$0xff] }
  0xb6   : > { %2124 = vmatpush3.bf16.msra.mxu1 %v2121_v14  ;;  %2094 = vmatprep.subr.bf16.mxu0 %v2093_v20  ;;  %v2189_v14 = vpack.c.bf16 %v1488_v12, %v1487_v11  ;;  %v1532_v11 = vld [vmem:[%s2787_s30 + $0x3e8] sm:$0xff] }
  0xb7   : > { %2126 = vmatprep.subr.bf16.mxu1 %v2125_v22 }
  0xb9   : > { %2096 = vmatpush3.bf16.msra.mxu0 %v2093_v20  ;;  %v2193_v20 = vpack.c.bf16 %v1490_v18, %v1489_v17  ;;  %v1534_v17 = vld [vmem:[%s2787_s30 + $0x3f8] sm:$0xff] }
  0xba   : > { %2128 = vmatpush3.bf16.msra.mxu1 %v2125_v22  ;;  %2098 = vmatprep.subr.bf16.mxu0 %v2097_v29  ;;  %v1472_v22 = vld [vmem:[%s2787_s30 + $0x268] sm:$0xff] }
  0xbb   : > { %2130 = vmatprep.subr.bf16.mxu1 %v2129_v31  ;;  %v2165_v25 = vpack.c.bf16 %v1472_v22, %v1471_v21 }
  0xbd   : > { %2100 = vmatpush3.bf16.msra.mxu0 %v2097_v29  ;;  %v1474_v29 = vld [vmem:[%s2787_s30 + $0x278] sm:$0xff] }
  0xbe   : > { %2132 = vmatpush3.bf16.msra.mxu1 %v2129_v31  ;;  %2102 = vmatprep.subr.bf16.mxu0 %v2101_v37  ;;  %v1494_v31 = vld [vmem:[%s2787_s30 + $0x2f8] sm:$0xff]  ;;  %v2169_v32 = vpack.c.bf16 %v1474_v29, %v1473_v28 }
  0xbf   : > { %2134 = vmatprep.subr.bf16.mxu1 %v2133_v39  ;;  %v2201_v33 = vpack.c.bf16 %v1494_v31, %v1493_v30 }
  0xc1   : > { %2104 = vmatpush3.bf16.msra.mxu0 %v2101_v37  ;;  %v1520_v37 = vld [vmem:[%s2787_s30 + $0x388] sm:$0xff] }
  0xc2   : > { %2136 = vmatpush3.bf16.msra.mxu1 %v2133_v39  ;;  %2106 = vmatprep.subr.bf16.mxu0 %v2105_v44  ;;  %v2237_v39 = vpack.c.bf16 %v1520_v37, %v1519_v36 }
  0xc3   : > { %2138 = vmatprep.subr.bf16.mxu1 %v2137_v45 }
  0xc5   : > { %2108 = vmatpush3.bf16.msra.mxu0 %v2105_v44  ;;  %v2209_v44 = vpack.c.bf16 %v1502_v41, %v1501_v40 }
  0xc6   : > { %2140 = vmatpush3.bf16.msra.mxu1 %v2137_v45  ;;  %2142 = vmatprep.subr.bf16.mxu0 %v2141_v50  ;;  %v2241_v45 = vpack.c.bf16 %v1522_v43, %v1521_v42 }
  0xc7   : > { %2174 = vmatprep.subr.bf16.mxu1 %v2173_v51 }
  0xc8   : > { %1818 = vmatmul.mubr.f32.vlgmr.msra.gmra.mrb[4].mxu0 %v2845_v60 }
  0xc9   : > { %1856 = vmatmul.mubr.f32.vlgmr.msra.gmra.mrb[4].mxu1 %v2845_v60  ;;  %2144 = vmatpush3.bf16.msra.mxu0 %v2141_v50  ;;  %v2213_v50 = vpack.c.bf16 %v1504_v47, %v1503_v46 }
  0xca   : > { %2176 = vmatpush3.bf16.msra.mxu1 %v2173_v51  ;;  %2146 = vmatprep.subr.bf16.mxu0 %v2145_v56  ;;  %v2245_v51 = vpack.c.bf16 %v1524_v49, %v1523_v48 }
  0xcb   : > { %2178 = vmatprep.subr.bf16.mxu1 %v2177_v57  ;;  %1820 = vmatprep.mubr.f32.mxu0 %v2852_v3 }
  0xcc   : > { %1858 = vmatprep.mubr.f32.mxu1 %v2852_v3  ;;  %1821 = vmatmul.mubr.f32.gmra.mrb[6].mxu0 %v2855_v4 }
  0xcd   : > { %2148 = vmatpush3.bf16.msra.mxu0 %v2145_v56  ;;  %1859 = vmatmul.mubr.f32.gmra.mrb[6].mxu1 %v2855_v4  ;;  %v2217_v56 = vpack.c.bf16 %v1506_v53, %v1505_v52 }
  0xce   : > { %2180 = vmatpush3.bf16.msra.mxu1 %v2177_v57  ;;  %2150 = vmatprep.subr.bf16.mxu0 %v2149_v63  ;;  %v2249_v57 = vpack.c.bf16 %v1526_v55, %v1525_v54 }
  0xcf   : > { %2182 = vmatprep.subr.bf16.mxu1 %v2181_v0  ;;  %1893 = vmatprep.mubr.f32.mxu0 %v2819_v27 }
  0xd0   : > { %1931 = vmatprep.mubr.f32.mxu1 %v2819_v27 }
  0xd1   : > { %2152 = vmatpush3.bf16.msra.mxu0 %v2149_v63  ;;  %v2221_v63 = vpack.c.bf16 %v1508_v59, %v1507_v58 }
  0xd2   : > { %2184 = vmatpush3.bf16.msra.mxu1 %v2181_v0  ;;  %2154 = vmatprep.subr.bf16.mxu0 %v2153_v7  ;;  %v2253_v0 = vpack.c.bf16 %v1528_v62, %v1527_v61 }
  0xd3   : > { %2186 = vmatprep.subr.bf16.mxu1 %v2185_v8 }
  0xd5   : > { %2156 = vmatpush3.bf16.msra.mxu0 %v2153_v7  ;;  %v2257_v7 = vpack.c.bf16 %v1530_v6, %v1529_v5 }
  0xd6   : > { %2188 = vmatpush3.bf16.msra.mxu1 %v2185_v8  ;;  %2158 = vmatprep.subr.bf16.mxu0 %v2157_v13  ;;  %v1511_v8 = vld [vmem:[%s2787_s30 + $0x360] sm:$0xff] }
  0xd7   : > { %2190 = vmatprep.subr.bf16.mxu1 %v2189_v14  ;;  %v2229_v12 = vpack.c.bf16 %v1512_v9, %v1511_v8 }
  0xd9   : > { %2160 = vmatpush3.bf16.msra.mxu0 %v2157_v13  ;;  %v2261_v13 = vpack.c.bf16 %v1532_v11, %v1531_v10 }
  0xda   : > { %2192 = vmatpush3.bf16.msra.mxu1 %v2189_v14  ;;  %2162 = vmatprep.subr.bf16.mxu0 %v2161_v19  ;;  %v1513_v14 = vld [vmem:[%s2787_s30 + $0x370] sm:$0xff] }
  0xdb   : > { %2194 = vmatprep.subr.bf16.mxu1 %v2193_v20  ;;  %v2233_v18 = vpack.c.bf16 %v1514_v15, %v1513_v14 }
  0xdd   : > { %2164 = vmatpush3.bf16.msra.mxu0 %v2161_v19  ;;  %v2265_v19 = vpack.c.bf16 %v1534_v17, %v1533_v16 }
  0xde   : > { %2196 = vmatpush3.bf16.msra.mxu1 %v2193_v20  ;;  %2166 = vmatprep.subr.bf16.mxu0 %v2165_v25 }
  0xdf   : > { %2198 = vmatprep.subr.bf16.mxu1 %v2197_v26 }
  0xe1   : > { %2168 = vmatpush3.bf16.msra.mxu0 %v2165_v25 }
  0xe2   : > { %2200 = vmatpush3.bf16.msra.mxu1 %v2197_v26  ;;  %2170 = vmatprep.subr.bf16.mxu0 %v2169_v32 }
  0xe3   : > { %2202 = vmatprep.subr.bf16.mxu1 %v2201_v33 }
  0xe5   : > { %2172 = vmatpush3.bf16.msra.mxu0 %v2169_v32 }
  0xe6   : > { %2204 = vmatpush3.bf16.msra.mxu1 %v2201_v33  ;;  %2206 = vmatprep.subr.bf16.mxu0 %v2205_v38 }
  0xe7   : > { %2238 = vmatprep.subr.bf16.mxu1 %v2237_v39 }
  0xe8   : > { %1894 = vmatmul.mubr.f32.vlgmr.msra.gmra.mrb[8].mxu0 %v2845_v60 }
  0xe9   : > { %1932 = vmatmul.mubr.f32.vlgmr.msra.gmra.mrb[8].mxu1 %v2845_v60  ;;  %2208 = vmatpush3.bf16.msra.mxu0 %v2205_v38 }
  0xea   : > { %2240 = vmatpush3.bf16.msra.mxu1 %v2237_v39  ;;  %2210 = vmatprep.subr.bf16.mxu0 %v2209_v44 }
  0xeb   : > { %2242 = vmatprep.subr.bf16.mxu1 %v2241_v45  ;;  %1896 = vmatprep.mubr.f32.mxu0 %v2852_v3 }
  0xec   : > { %1934 = vmatprep.mubr.f32.mxu1 %v2852_v3  ;;  %1897 = vmatmul.mubr.f32.gmra.mrb[10].mxu0 %v2855_v4 }
  0xed   : > { %2212 = vmatpush3.bf16.msra.mxu0 %v2209_v44  ;;  %1935 = vmatmul.mubr.f32.gmra.mrb[10].mxu1 %v2855_v4 }
  0xee   : > { %2244 = vmatpush3.bf16.msra.mxu1 %v2241_v45  ;;  %2214 = vmatprep.subr.bf16.mxu0 %v2213_v50 }
  0xef   : > { %2246 = vmatprep.subr.bf16.mxu1 %v2245_v51  ;;  %1969 = vmatprep.mubr.f32.mxu0 %v2819_v27 }
  0xf0   : > { %2007 = vmatprep.mubr.f32.mxu1 %v2819_v27  ;;  %v2225_v27 = vpack.c.bf16 %v1510_v2, %v1509_v1 }
  0xf1   : > { %2216 = vmatpush3.bf16.msra.mxu0 %v2213_v50 }
  0xf2   : > { %2248 = vmatpush3.bf16.msra.mxu1 %v2245_v51  ;;  %2218 = vmatprep.subr.bf16.mxu0 %v2217_v56 }
  0xf3   : > { %2250 = vmatprep.subr.bf16.mxu1 %v2249_v57 }
  0xf5   : > { %2220 = vmatpush3.bf16.msra.mxu0 %v2217_v56 }
  0xf6   : > { %2252 = vmatpush3.bf16.msra.mxu1 %v2249_v57  ;;  %2222 = vmatprep.subr.bf16.mxu0 %v2221_v63 }
  0xf7   : > { %2254 = vmatprep.subr.bf16.mxu1 %v2253_v0 }
  0xf9   : > { %2224 = vmatpush3.bf16.msra.mxu0 %v2221_v63 }
  0xfa   : > { %2256 = vmatpush3.bf16.msra.mxu1 %v2253_v0  ;;  %2226 = vmatprep.subr.bf16.mxu0 %v2225_v27 }
  0xfb   : > { %2258 = vmatprep.subr.bf16.mxu1 %v2257_v7 }
  0xfd   : > { %2228 = vmatpush3.bf16.msra.mxu0 %v2225_v27 }
  0xfe   : > { %2260 = vmatpush3.bf16.msra.mxu1 %v2257_v7  ;;  %2230 = vmatprep.subr.bf16.mxu0 %v2229_v12 }
  0xff   : > { %2262 = vmatprep.subr.bf16.mxu1 %v2261_v13 }
 0x101   : > { %2232 = vmatpush3.bf16.msra.mxu0 %v2229_v12 }
 0x102   : > { %2264 = vmatpush3.bf16.msra.mxu1 %v2261_v13  ;;  %2234 = vmatprep.subr.bf16.mxu0 %v2233_v18 }
 0x103   : > { %2266 = vmatprep.subr.bf16.mxu1 %v2265_v19 }
 0x105   : > { %2236 = vmatpush3.bf16.msra.mxu0 %v2233_v18 }
 0x106   : > { %2268 = vmatpush3.bf16.msra.mxu1 %v2265_v19 }
 0x108   : > { %1970 = vmatmul.mubr.f32.vlgmr.msra.gmra.mrb[12].mxu0 %v2845_v60 }
 0x109   : > { %2008 = vmatmul.mubr.f32.vlgmr.msra.gmra.mrb[12].mxu1 %v2845_v60  ;;  %1972 = vmatprep.mubr.f32.mxu0 %v2852_v3 }
 0x10a   : > { %2010 = vmatprep.mubr.f32.mxu1 %v2852_v3 }
 0x10c   : > { %1973 = vmatmul.mubr.f32.gmra.mrb[14].mxu0 %v2855_v4 }
 0x10d   : > { %2011 = vmatmul.mubr.f32.gmra.mrb[14].mxu1 %v2855_v4 }
 0x116   : > { %v2971_v21 = vpop.permute.xlu0 %378 }
 0x117   : > { %v2969_v20 = vpop.permute.xlu1 %388 }
 0x11a   : > { %v2975_v23 = vpop.permute.xlu0 %383 }
 0x11b   : > { %v2973_v22 = vpop.permute.xlu1 %393 }
 0x11e   : > { %v2979_v60 = vpop.permute.xlu0 %402 }
 0x11f   : > { %v2977_v24 = vpop.permute.xlu1 %407 }
 0x122   : > { %v2991_v37 = vpop.permute.xlu0 %412 }
 0x123   : > { %v2987_v33 = vpop.permute.xlu1 %417 }
 0x17b   : > { %v1743_v25 = vpop.f32.mrb[0].mxu0 }
 0x17c   : > { %v397_v26 = vmul.f32 %v1743_v25, %v2975_v23  ;;  %v1781_v3 = vpop.f32.mrb[0].mxu1  ;;  %v357_v28 = vpop.f32.mrb[1].mxu0 }
 0x17d   : > { %v536_v4 = vmul.f32 %v1781_v3, %v2975_v23  ;;  %v396_v29 = vmul.f32 %v2971_v21, %v357_v28  ;;  %v516_v30 = vpop.f32.mrb[1].mxu1 }
 0x17e   : > { %v535_v31 = vmul.f32 %v516_v30, %v2971_v21  ;;  %v421_v32 = vadd.f32 %v2977_v24, %v397_v26 }
 0x17f   : > { %v540_v34 = vadd.f32 %v536_v4, %v2977_v24  ;;  %v420_v35 = vadd.f32 %v2979_v60, %v396_v29  ;;  %v1746_v36 = vpop.f32.mrb[2].mxu0 }
 0x180   : > { %v425_v38 = vmax.f32 %v421_v32, 0.0  ;;  %v539_v39 = vadd.f32 %v535_v31, %v2979_v60  ;;  %v399_v40 = vmul.f32 %v1746_v36, %v2973_v22  ;;  %v1784_v41 = vpop.f32.mrb[2].mxu1  ;;  %v367_v42 = vpop.f32.mrb[3].mxu0 }
 0x181   : > { %v544_v43 = vmax.f32 %v540_v34, 0.0  ;;  %v424_v44 = vmax.f32 %v420_v35, 0.0  ;;  %v538_v45 = vmul.f32 %v1784_v41, %v2973_v22  ;;  %v398_v46 = vmul.f32 %v2969_v20, %v367_v42  ;;  %v526_v47 = vpop.f32.mrb[3].mxu1 }
 0x182   : > { %430 = vst.msk [vmem:[%s2997_s23 + $0x8] sm:$0xff] %vm428_vm0, %v425_v38  ;;  %v543_v48 = vmax.f32 %v539_v39, 0.0  ;;  %v537_v49 = vmul.f32 %v526_v47, %v2969_v20  ;;  %v423_v50 = vadd.f32 %v2987_v33, %v399_v40 }
 0x183   : > { %1416 = vst.msk [vmem:[%s2997_s23 + $0x28] sm:$0xff] %vm428_vm0, %v544_v43  ;;  %429 = vst.msk [vmem:[%s2997_s23] sm:$0xff] %vm428_vm0, %v424_v44  ;;  %v542_v51 = vadd.f32 %v538_v45, %v2987_v33  ;;  %v422_v52 = vadd.f32 %v2991_v37, %v398_v46 }
 0x184   : > { %1415 = vst.msk [vmem:[%s2997_s23 + $0x20] sm:$0xff] %vm428_vm0, %v543_v48  ;;  %v427_v53 = vmax.f32 %v423_v50, 0.0  ;;  %v541_v54 = vadd.f32 %v537_v49, %v2991_v37 }
 0x185   : > { %v546_v55 = vmax.f32 %v542_v51, 0.0  ;;  %v426_v56 = vmax.f32 %v422_v52, 0.0 }
 0x186   : > { %432 = vst.msk [vmem:[%s2997_s23 + $0x18] sm:$0xff] %vm428_vm0, %v427_v53  ;;  %v545_v57 = vmax.f32 %v541_v54, 0.0 }
 0x187   : > { %1418 = vst.msk [vmem:[%s2997_s23 + $0x38] sm:$0xff] %vm428_vm0, %v546_v55  ;;  %431 = vst.msk [vmem:[%s2997_s23 + $0x10] sm:$0xff] %vm428_vm0, %v426_v56 }
 0x188   : > { %1417 = vst.msk [vmem:[%s2997_s23 + $0x30] sm:$0xff] %vm428_vm0, %v545_v57 }
 0x19b   : > { %v1819_v58 = vpop.f32.mrb[4].mxu0 }
 0x19c   : > { %v655_v59 = vmul.f32 %v1819_v58, %v2975_v23  ;;  %v1857_v61 = vpop.f32.mrb[4].mxu1  ;;  %v635_v62 = vpop.f32.mrb[5].mxu0 }
 0x19d   : > { %v774_v63 = vmul.f32 %v1857_v61, %v2975_v23  ;;  %v654_v0 = vmul.f32 %v635_v62, %v2971_v21  ;;  %v754_v1 = vpop.f32.mrb[5].mxu1 }
 0x19e   : > { %v659_v2 = vadd.f32 %v655_v59, %v2977_v24  ;;  %v773_v5 = vmul.f32 %v754_v1, %v2971_v21 }
 0x19f   : > { %v778_v6 = vadd.f32 %v774_v63, %v2977_v24  ;;  %v658_v27 = vadd.f32 %v654_v0, %v2979_v60  ;;  %v1822_v7 = vpop.f32.mrb[6].mxu0 }
 0x1a0   : > { %v663_v8 = vmax.f32 %v659_v2, 0.0  ;;  %v777_v9 = vadd.f32 %v773_v5, %v2979_v60  ;;  %v657_v10 = vmul.f32 %v1822_v7, %v2973_v22  ;;  %v1860_v11 = vpop.f32.mrb[6].mxu1  ;;  %v645_v12 = vpop.f32.mrb[7].mxu0 }
 0x1a1   : > { %v782_v13 = vmax.f32 %v778_v6, 0.0  ;;  %v662_v14 = vmax.f32 %v658_v27, 0.0  ;;  %v776_v15 = vmul.f32 %v1860_v11, %v2973_v22  ;;  %v656_v16 = vmul.f32 %v645_v12, %v2969_v20  ;;  %v764_v17 = vpop.f32.mrb[7].mxu1 }
 0x1a2   : > { %1436 = vst.msk [vmem:[%s2997_s23 + $0x48] sm:$0xff] %vm428_vm0, %v663_v8  ;;  %v781_v18 = vmax.f32 %v777_v9, 0.0  ;;  %v661_v19 = vadd.f32 %v657_v10, %v2987_v33  ;;  %v775_v25 = vmul.f32 %v764_v17, %v2969_v20 }
 0x1a3   : > { %1456 = vst.msk [vmem:[%s2997_s23 + $0x68] sm:$0xff] %vm428_vm0, %v782_v13  ;;  %1435 = vst.msk [vmem:[%s2997_s23 + $0x40] sm:$0xff] %vm428_vm0, %v662_v14  ;;  %v780_v26 = vadd.f32 %v776_v15, %v2987_v33  ;;  %v660_v3 = vadd.f32 %v656_v16, %v2991_v37 }
 0x1a4   : > { %1455 = vst.msk [vmem:[%s2997_s23 + $0x60] sm:$0xff] %vm428_vm0, %v781_v18  ;;  %v665_v28 = vmax.f32 %v661_v19, 0.0  ;;  %v779_v4 = vadd.f32 %v775_v25, %v2991_v37 }
 0x1a5   : > { %v784_v29 = vmax.f32 %v780_v26, 0.0  ;;  %v664_v30 = vmax.f32 %v660_v3, 0.0 }
 0x1a6   : > { %1438 = vst.msk [vmem:[%s2997_s23 + $0x58] sm:$0xff] %vm428_vm0, %v665_v28  ;;  %v783_v31 = vmax.f32 %v779_v4, 0.0 }
 0x1a7   : > { %1458 = vst.msk [vmem:[%s2997_s23 + $0x78] sm:$0xff] %vm428_vm0, %v784_v29  ;;  %1437 = vst.msk [vmem:[%s2997_s23 + $0x50] sm:$0xff] %vm428_vm0, %v664_v30 }
 0x1a8   : > { %1457 = vst.msk [vmem:[%s2997_s23 + $0x70] sm:$0xff] %vm428_vm0, %v783_v31 }
 0x1bb   : > { %v1895_v32 = vpop.f32.mrb[8].mxu0 }
 0x1bc   : > { %v893_v34 = vmul.f32 %v1895_v32, %v2975_v23  ;;  %v1933_v35 = vpop.f32.mrb[8].mxu1  ;;  %v873_v36 = vpop.f32.mrb[9].mxu0 }
 0x1bd   : > { %v1012_v38 = vmul.f32 %v1933_v35, %v2975_v23  ;;  %v892_v39 = vmul.f32 %v873_v36, %v2971_v21  ;;  %v992_v40 = vpop.f32.mrb[9].mxu1 }
 0x1be   : > { %v897_v41 = vadd.f32 %v893_v34, %v2977_v24  ;;  %v1011_v42 = vmul.f32 %v992_v40, %v2971_v21 }
 0x1bf   : > { %v1016_v43 = vadd.f32 %v1012_v38, %v2977_v24  ;;  %v896_v44 = vadd.f32 %v892_v39, %v2979_v60  ;;  %v1898_v45 = vpop.f32.mrb[10].mxu0 }
 0x1c0   : > { %v901_v46 = vmax.f32 %v897_v41, 0.0  ;;  %v1015_v47 = vadd.f32 %v1011_v42, %v2979_v60  ;;  %v895_v48 = vmul.f32 %v1898_v45, %v2973_v22  ;;  %v1936_v49 = vpop.f32.mrb[10].mxu1  ;;  %v883_v50 = vpop.f32.mrb[11].mxu0 }
 0x1c1   : > { %v1020_v51 = vmax.f32 %v1016_v43, 0.0  ;;  %v900_v52 = vmax.f32 %v896_v44, 0.0  ;;  %v1014_v53 = vmul.f32 %v1936_v49, %v2973_v22  ;;  %v894_v54 = vmul.f32 %v883_v50, %v2969_v20  ;;  %v1002_v55 = vpop.f32.mrb[11].mxu1 }
 0x1c2   : > { %1476 = vst.msk [vmem:[%s2997_s23 + $0x88] sm:$0xff] %vm428_vm0, %v901_v46  ;;  %v1019_v56 = vmax.f32 %v1015_v47, 0.0  ;;  %v899_v57 = vadd.f32 %v895_v48, %v2987_v33  ;;  %v1013_v58 = vmul.f32 %v1002_v55, %v2969_v20 }
 0x1c3   : > { %1496 = vst.msk [vmem:[%s2997_s23 + $0xa8] sm:$0xff] %vm428_vm0, %v1020_v51  ;;  %1475 = vst.msk [vmem:[%s2997_s23 + $0x80] sm:$0xff] %vm428_vm0, %v900_v52  ;;  %v1018_v59 = vadd.f32 %v1014_v53, %v2987_v33  ;;  %v898_v61 = vadd.f32 %v894_v54, %v2991_v37 }
 0x1c4   : > { %1495 = vst.msk [vmem:[%s2997_s23 + $0xa0] sm:$0xff] %vm428_vm0, %v1019_v56  ;;  %v903_v62 = vmax.f32 %v899_v57, 0.0  ;;  %v1017_v63 = vadd.f32 %v1013_v58, %v2991_v37 }
 0x1c5   : > { %v1022_v0 = vmax.f32 %v1018_v59, 0.0  ;;  %v902_v1 = vmax.f32 %v898_v61, 0.0 }
 0x1c6   : > { %1478 = vst.msk [vmem:[%s2997_s23 + $0x98] sm:$0xff] %vm428_vm0, %v903_v62  ;;  %v1021_v2 = vmax.f32 %v1017_v63, 0.0 }
 0x1c7   : > { %1498 = vst.msk [vmem:[%s2997_s23 + $0xb8] sm:$0xff] %vm428_vm0, %v1022_v0  ;;  %1477 = vst.msk [vmem:[%s2997_s23 + $0x90] sm:$0xff] %vm428_vm0, %v902_v1 }
 0x1c8   : > { %1497 = vst.msk [vmem:[%s2997_s23 + $0xb0] sm:$0xff] %vm428_vm0, %v1021_v2 }
 0x1db   : > { %v1971_v5 = vpop.f32.mrb[12].mxu0 }
 0x1dc   : > { %v1131_v6 = vmul.f32 %v1971_v5, %v2975_v23  ;;  %v2009_v27 = vpop.f32.mrb[12].mxu1  ;;  %v1111_v7 = vpop.f32.mrb[13].mxu0 }
 0x1dd   : > { %v1250_v8 = vmul.f32 %v2009_v27, %v2975_v23  ;;  %v1130_v9 = vmul.f32 %v1111_v7, %v2971_v21  ;;  %v1230_v10 = vpop.f32.mrb[13].mxu1 }
 0x1de   : > { %v1135_v11 = vadd.f32 %v1131_v6, %v2977_v24  ;;  %v1249_v12 = vmul.f32 %v1230_v10, %v2971_v21 }
 0x1df   : > { %v1254_v13 = vadd.f32 %v1250_v8, %v2977_v24  ;;  %v1134_v14 = vadd.f32 %v1130_v9, %v2979_v60  ;;  %v1974_v15 = vpop.f32.mrb[14].mxu0 }
 0x1e0   : > { %v1139_v16 = vmax.f32 %v1135_v11, 0.0  ;;  %v1253_v17 = vadd.f32 %v1249_v12, %v2979_v60  ;;  %v1133_v23 = vmul.f32 %v1974_v15, %v2973_v22  ;;  %v2012_v18 = vpop.f32.mrb[14].mxu1  ;;  %v1121_v19 = vpop.f32.mrb[15].mxu0 }
 0x1e1   : > { %v1258_v25 = vmax.f32 %v1254_v13, 0.0  ;;  %v1138_v26 = vmax.f32 %v1134_v14, 0.0  ;;  %v1252_v21 = vmul.f32 %v2012_v18, %v2973_v22  ;;  %v1132_v24 = vmul.f32 %v1121_v19, %v2969_v20  ;;  %v1240_v3 = vpop.f32.mrb[15].mxu1 }
 0x1e2   : > { %1516 = vst.msk [vmem:[%s2997_s23 + $0xc8] sm:$0xff] %vm428_vm0, %v1139_v16  ;;  %v1257_v28 = vmax.f32 %v1253_v17, 0.0  ;;  %v1137_v4 = vadd.f32 %v1133_v23, %v2987_v33  ;;  %v1251_v60 = vmul.f32 %v1240_v3, %v2969_v20 }
 0x1e3   : > { %1536 = vst.msk [vmem:[%s2997_s23 + $0xe8] sm:$0xff] %vm428_vm0, %v1258_v25  ;;  %1515 = vst.msk [vmem:[%s2997_s23 + $0xc0] sm:$0xff] %vm428_vm0, %v1138_v26  ;;  %v1256_v22 = vadd.f32 %v1252_v21, %v2987_v33  ;;  %v1136_v29 = vadd.f32 %v1132_v24, %v2991_v37 }
 0x1e4   : > { %1535 = vst.msk [vmem:[%s2997_s23 + $0xe0] sm:$0xff] %vm428_vm0, %v1257_v28  ;;  %v1141_v30 = vmax.f32 %v1137_v4, 0.0  ;;  %v1255_v20 = vadd.f32 %v1251_v60, %v2991_v37 }
 0x1e5   : > { %v1260_v31 = vmax.f32 %v1256_v22, 0.0  ;;  %v1140_v32 = vmax.f32 %v1136_v29, 0.0 }
 0x1e6   : > { %1518 = vst.msk [vmem:[%s2997_s23 + $0xd8] sm:$0xff] %vm428_vm0, %v1141_v30  ;;  %v1259_v33 = vmax.f32 %v1255_v20, 0.0 }
 0x1e7   : > { %1538 = vst.msk [vmem:[%s2997_s23 + $0xf8] sm:$0xff] %vm428_vm0, %v1260_v31  ;;  %1517 = vst.msk [vmem:[%s2997_s23 + $0xd0] sm:$0xff] %vm428_vm0, %v1140_v32 }
 0x1e8   : > { %1537 = vst.msk [vmem:[%s2997_s23 + $0xf0] sm:$0xff] %vm428_vm0, %v1259_v33 }
 0x1e9   : > { %2480 = shalt.err (!%p2477_p4)
}
 0x1ea   : > { %s2481_s7 = scalar_lea.hbm %s3113_s8, 4096  ;;  %s2485_s27 = scalar_lea.hbm %s3171_s4, 8192 }
 0x1eb   : > { %p2482_p9 = scmp.ne.s32.totalorder %s3113_s8, %s2481_s7  ;;  %p2486_p8 = scmp.lt.u32.totalorder %s3113_s8, %s3171_s4 }
 0x1ec   : > { %p2487_p13 = scmp.lt.u32.totalorder %s2485_s27, %s2481_s7  ;;  %p2489_p10 = scmp.lt.u32.totalorder %s2481_s7, %s3113_s8 }
 0x1ed   : > { %p2483_p0 = pnand %p2482_p9, %p2732_p5 }
 0x1ee   : > { %p2488_p6 = por %p2487_p13, %p2486_p8 }
 0x1ef   : > { %p2484_p11 = pneg %p2483_p0 }
 0x1f0   : > { %p2490_p3 = por %p2489_p10, %p2488_p6 }
 0x1f2   : > { %p2491_p7 = pnand %p2490_p3, %p2484_p11 }
 0x1f4   : > { %2494 = shalt.err (!%p2491_p7)
}
 0x1f5   : > { %s2551_s23 = smov 128   ;;  %s2552_s14 = smov 8  }
 0x1f6   : > { %2283 = dma.vmem_to_hbm [thread:$0]  (%p2732_p5), %s3115_s20, 4096, %s3113_s8, %s1267_s9, %s2551_s23, %s2551_s23, %s2552_s14  }
 0x1f7 PF: > { %s1296_s19 = sand.u32 1, %s2529_s15   ;;  %p3189_p12 = scmp.ne.s32.totalorder %s3176_s22, 0 }
 0x1f8   : > { %p3190_p1 = scmp.ge.s32.totalorder %s2541_s18, 2  ;;  %s1297_s6 = scalar_lea.sflag [#allocation4], %s1296_s19 }
 0x1fa   : > { %p2300_p2 = pnand %p3190_p1, %p3189_p12 }
 0x1fc   : > { %2524 = dma.done.wait (!%p2300_p2), %s1297_s6, 4096  }
 0x1fd   : > { %2526 = vsyncadd (!%p2300_p2), %s1297_s6, 4294963200  ;;  %p19_p4 = scmp.ge.s32.totalorder %s2718_s10, 4   ;;  %s3191_s15 = smov %s2533_s16 }
 0x1fe   : > { %s3192_s16 = smov %s2537_s17  ;;  %s3193_s17 = smov %s2728_s12 }
 0x1ff   : > { %s3194_s18 = smov %s2718_s10  ;;  %21 = sbr.rel (!%p19_p4) target bundleno = 7 (0x7), region = 107 }
 0x206   :  { %1302 = vsyncpa [#allocation3], 1 }
 0x207   :  { %1304 = vsyncpa [#allocation3 + $0x1], 1 }
 0x208   :  { %1305 = vsyncpa [#allocation6], 1 }
 0x209   :  { %1306 = vsyncpa [#allocation9], 1 }
 0x20a   :  { %1307 = vsyncpa [#allocation4], 1 }
 0x20b   :  { %1309 = vsyncpa [#allocation4 + $0x1], 1 }

// kernel: _lambda_.3
= control target key start
LH: loop header
LB: loop body
LE: loop exit
PB: predicated region body
PF: predicated region fallthrough
CT: control target
= control target key end

     0   :  { %8 = vsyncpa [#allocation3], 0  ;;  %s2227_s0 = inlined_call_operand.hbm [shape: f32[16,2048], index: 0, kind: input, shape index: {}]   ;;  %s2228_s1 = inlined_call_operand.hbm [shape: f32[2048,128], index: 1, kind: input, shape index: {}]   ;;  %s2229_s2 = inlined_call_operand.hbm [shape: f32[1,128], index: 2, kind: input, shape index: {}]   ;;  %s2230_s3 = inlined_call_operand.hbm [shape: f32[16,128], index: 3, kind: output, shape index: {}]  }
   0x1   :  { %10 = vsyncpa [#allocation3 + $0x1], 0 }
   0x2   :  { %11 = vsyncpa [#allocation6], 0 }
   0x3   :  { %12 = vsyncpa [#allocation4], 0 }
   0x4   :  { %14 = vsyncpa [#allocation4 + $0x1], 0  ;;  %s1978_s12 = smov 0   ;;  %s1980_s13 = smov 0  }
   0x5   :  { %s1982_s14 = smov 0   ;;  %s1984_s15 = smov 0  }
   0x6 LB: > { %s1999_s16 = sadd.s32 4294967295, %s1950_s15   ;;  %s1166_s17 = sadd.s32 4294967294, %s1950_s15   ;;  %s1950_s15 = sphi %s1984_s15, %s2250_s15   ;;  %s1946_s14 = sphi %s1982_s14, %s2249_s14   ;;  %s1942_s13 = sphi %s1980_s13, %s2248_s13   ;;  %s1938_s12 = sphi %s1978_s12, %s2247_s12  }
   0x7   : > { %p40_p0 = scmp.ne.s32.totalorder %s1942_s13, %s1938_s12  ;;  %p2231_p1 = scmp.eq.s32.totalorder %s1999_s16, 0 }
   0x8   : > { %p112_p3 = scmp.eq.s32.totalorder %s1166_s17, 1  ;;  %p1167_p5 = scmp.ge.s32.totalorder %s1950_s15, 1 }
   0x9   : > { %p2008_p4 = por %p2231_p1, %p40_p0  ;;  %p119_p7 = scmp.lt.s32.totalorder %s1950_s15, 3 }
   0xa   : > { %p2013_p6 = por %p112_p3, %p40_p0  ;;  %s1952_s21 = smov [#allocation5]  }
   0xb   : > { %s2234_s18 = scalar_select %p2008_p4, 1, 0 }
   0xc   : > { %s2235_s19 = scalar_select %p2013_p6, 1, 0 }
   0xd   : > { %p2018_p8 = pnand %p1167_p5, %p119_p7  ;;  %s131_s22 = sshll.u32 %s1952_s21, 4  ;;  %s2022_s22 = int_to_ptr.vmem [resolvable:$true] %s131_s22 }
   0xe   : > { %s1953_s24 = smov [#allocation7]   ;;  %s1794_s28 = scalar_lea.hbm %s2228_s1, 32768 }
   0xf   : > { %p1733_p9 = pneg %p2018_p8  ;;  %s145_s25 = sshll.u32 %s1953_s24, 4  ;;  %s2033_s25 = int_to_ptr.vmem [resolvable:$true] %s145_s25 }
  0x10   : > { %p1795_p12 = scmp.ne.s32.totalorder %s2228_s1, %s1794_s28  ;;  %p1801_p5 = scmp.lt.u32.totalorder %s1794_s28, %s2228_s1 }
  0x11   : > { %p2029_p11 = pnand %p1733_p9, %p2231_p1 }
  0x13   : > { %p1796_p13 = pneg %p2029_p11 }
  0x15   : > { %p1797_p0 = pnand %p1796_p13, %p1795_p12 }
  0x17   : > { %p1798_p3 = pneg %p1797_p0 }
  0x19   : > { %p1803_p7 = pnand %p1801_p5, %p1798_p3 }
  0x1b   : > { %1806 = shalt.err (!%p1803_p7)
}
  0x1c   : > { %s1807_s6 = scalar_lea.vmem %s2022_s22, 32768  ;;  %p1815_p2 = scmp.lt.s32.totalorder %s2022_s22, %s2022_s22 }
  0x1d   : > { %p1808_p9 = scmp.ne.s32.totalorder %s2022_s22, %s1807_s6  ;;  %p1816_p12 = scmp.lt.s32.totalorder %s1807_s6, %s1807_s6 }
  0x1f   : > { %p1810_p10 = pnand %p1808_p9, %p1796_p13  ;;  %p1817_p0 = por %p1816_p12, %p1815_p2 }
  0x21   : > { %p1811_p1 = pneg %p1810_p10 }
  0x23   : > { %p1818_p6 = pnand %p1817_p0, %p1811_p1 }
  0x25   : > { %1821 = shalt.err (!%p1818_p6)
}
  0x26   : > { %s1954_s7 = smov 128   ;;  %s1955_s8 = smov 8  }
  0x27   : > { %1736 = dma.hbm_to_vmem [thread:$0]  (!%p2029_p11), %s2228_s1, 32768, %s2022_s22, [#allocation6], %s1954_s7, %s1954_s7, %s1955_s8  }
  0x28   : > { %s1822_s21 = scalar_lea.hbm %s2229_s2, 16 }
  0x29   : > { %p1823_p2 = scmp.ne.s32.totalorder %s2229_s2, %s1822_s21  ;;  %p1829_p10 = scmp.lt.u32.totalorder %s1822_s21, %s2229_s2 }
  0x2b   : > { %p1825_p1 = pnand %p1823_p2, %p1796_p13 }
  0x2d   : > { %p1826_p6 = pneg %p1825_p1 }
  0x2f   : > { %p1831_p3 = pnand %p1829_p10, %p1826_p6 }
  0x31   : > { %1834 = shalt.err (!%p1831_p3)
}
  0x32   : > { %s1835_s22 = scalar_lea.vmem %s2033_s25, 16  ;;  %s1842_s29 = scalar_lea.vmem %s2033_s25, 32 }
  0x33   : > { %p1836_p5 = scmp.ne.s32.totalorder %s2033_s25, %s1835_s22  ;;  %p1843_p12 = scmp.lt.s32.totalorder %s2033_s25, %s2033_s25 }
  0x34   : > { %p1844_p0 = scmp.lt.s32.totalorder %s1842_s29, %s1835_s22 }
  0x35   : > { %p1838_p7 = pnand %p1836_p5, %p1796_p13 }
  0x36   : > { %p1845_p2 = por %p1844_p0, %p1843_p12 }
  0x37   : > { %p1839_p9 = pneg %p1838_p7 }
  0x39   : > { %p1846_p1 = pnand %p1845_p2, %p1839_p9 }
  0x3b   : > { %1849 = shalt.err (!%p1846_p1)
}
  0x3c   : > { %1739 = dma.hbm_to_vmem [thread:$0]  (!%p2029_p11), %s2229_s2, 16, %s2033_s25, [#allocation6]  }
  0x3d   : > { %s2089_s5 = sadd.s32 1, %s1950_s15   ;;  %s27_s23 = sadd.s32 1, %s1946_s14 }
  0x3e   : > { %s24_s6 = ssub.s32 %s1950_s15, %s2089_s5  ;;  %p34_p13 = scmp.ne.s32.totalorder %s1946_s14, %s1942_s13 }
  0x3f   : > { %p25_p6 = scmp.eq.s32.totalorder %s24_s6, 0  ;;  %p35_p10 = scmp.eq.s32.totalorder %s1950_s15, 0 }
  0x40   : > { %p2238_p3 = scmp.eq.s32.totalorder %s1999_s16, 1  ;;  %p1750_p7 = scmp.lt.s32.totalorder %s1950_s15, 2 }
  0x41   : > { %s2105_s8 = scalar_select %p25_p6, %s1946_s14, %s27_s23  }
  0x42   : > { %p2099_p5 = por %p2238_p3, %p34_p13  ;;  %p36_p9 = por %p35_p10, %p34_p13 }
  0x43   : > { %s156_s9 = sand.u32 1, %s1946_s14   ;;  %s1184_s25 = sshll.u32 %s1950_s15, 11 }
  0x44   : > { %s2239_s7 = scalar_select %p2099_p5, 1, 0 }
  0x45   : > { %s1171_s10 = sshll.u32 %s156_s9, 7  ;;  %s2112_s21 = scalar_lea.hbm %s2227_s0, %s1184_s25 }
  0x46   : > { %s160_s24 = scalar_lea.vmem [#allocation2], %s1171_s10  ;;  %p2116_p11 = pnand %p1750_p7, %p36_p9 }
  0x47   : > { %s168_s26 = sshll.u32 %s160_s24, 4  ;;  %s157_s28 = scalar_lea.sflag [#allocation3], %s156_s9  ;;  %s2114_s26 = int_to_ptr.vmem [resolvable:$true] %s168_s26 }
  0x48   : > { %s1850_s22 = scalar_lea.hbm %s2112_s21, 2048  ;;  %p1852_p0 = pneg %p2116_p11 }
  0x49   : > { %p1851_p12 = scmp.ne.s32.totalorder %s2112_s21, %s1850_s22  ;;  %s1855_s4 = scalar_lea.hbm %s2227_s0, 4096 }
  0x4a   : > { %p1856_p13 = scmp.lt.u32.totalorder %s2112_s21, %s2227_s0  ;;  %p1857_p6 = scmp.lt.u32.totalorder %s1855_s4, %s1850_s22 }
  0x4b   : > { %p1853_p2 = pnand %p1852_p0, %p1851_p12  ;;  %p1859_p3 = scmp.lt.u32.totalorder %s1850_s22, %s2112_s21 }
  0x4c   : > { %p1858_p10 = por %p1857_p6, %p1856_p13 }
  0x4d   : > { %p1854_p1 = pneg %p1853_p2 }
  0x4e   : > { %p1860_p7 = por %p1859_p3, %p1858_p10 }
  0x50   : > { %p1861_p9 = pnand %p1860_p7, %p1854_p1 }
  0x52   : > { %1864 = shalt.err (!%p1861_p9)
}
  0x53   : > { %s1865_s9 = scalar_lea.vmem %s2114_s26, 2048  ;;  %s1956_s10 = smov [#allocation2]  }
  0x54   : > { %p1866_p12 = scmp.ne.s32.totalorder %s2114_s26, %s1865_s9  ;;  %s1870_s25 = sshll.u32 %s1956_s10, 4  ;;  %s1871_s25 = int_to_ptr.vmem [resolvable:$false] %s1870_s25 }
  0x55   : > { %s1872_s11 = scalar_lea.vmem %s1871_s25, 4096  ;;  %p1873_p4 = scmp.lt.s32.totalorder %s2114_s26, %s1871_s25 }
  0x56   : > { %p1868_p2 = pnand %p1866_p12, %p1852_p0  ;;  %p1874_p13 = scmp.lt.s32.totalorder %s1872_s11, %s1865_s9 }
  0x58   : > { %p1869_p5 = pneg %p1868_p2  ;;  %p1875_p6 = por %p1874_p13, %p1873_p4 }
  0x5a   : > { %p1876_p10 = pnand %p1875_p6, %p1869_p5 }
  0x5c   : > { %1879 = shalt.err (!%p1876_p10)
}
  0x5d   : > { %1743 = dma.hbm_to_vmem [thread:$0]  (!%p2116_p11), %s2112_s21, 2048, %s2114_s26, %s157_s28  }
  0x5e   : > { %177 = sbr.rel (%p2018_p8) target bundleno = 781 (0x30d), region = 32  ;;  %s2148_s17 = sand.u32 (!%p2018_p8), 1, %s1942_s13  }
  0x5f   : > { %s1175_s24 = sshll.u32 (!%p2018_p8), %s2148_s17, 7  ;;  %s180_s22 = scalar_lea.sflag (!%p2018_p8), [#allocation3], %s2148_s17 }
  0x60   : > { %s2152_s29 = scalar_lea.vmem (!%p2018_p8), [#allocation2], %s1175_s24  ;;  %p2241_p4 = scmp.ne.s32.totalorder (!%p2018_p8), %s2234_s18, 0 }
  0x65   : > { %1925 = dma.done.wait (%p2241_p4), %s180_s22, 2048  }
  0x66   : > { %1927 = vsyncadd (%p2241_p4), %s180_s22, 4294965248  ;;  %p2242_p5 = scmp.eq.s32.totalorder %s1999_s16, 0 }
  0x68   : > { %1929 = dma.done.wait (%p2242_p5), [#allocation6], 32784   ;;  %p2243_p8 = pmov %p2242_p5 }
  0x69   : > { %v246_v0 = vld [vmem:[#allocation5 + $0x80] sm:$0xff]  ;;  %v247_v1 = vld [vmem:[#allocation5 + $0x88] sm:$0xff]  ;;  %v248_v11 = vld [vmem:[#allocation5 + $0x90] sm:$0xff]  ;;  %s1178_s18 = sshll.u32 %s2148_s17, 3  ;;  %s1181_s20 = sshll.u32 %s1999_s16, 7 }
  0x6a   : > { %1931 = vsyncadd (%p2243_p8), [#allocation6], 4294934512  ;;  %v230_v2 = vld [vmem:[#allocation5] sm:$0xff]  ;;  %v1465_v3 = vpack.c.bf16 %v247_v1, %v246_v0  ;;  %v231_v4 = vld [vmem:[#allocation5 + $0x8] sm:$0xff]  ;;  %s213_s21 = scalar_lea.vmem [#allocation8], %s1178_s18  ;;  %s2183_s30 = scalar_lea.hbm %s2230_s3, %s1181_s20 }
  0x6b   : > { %v278_v5 = vld [vmem:[#allocation5 + $0x180] sm:$0xff]  ;;  %v279_v6 = vld [vmem:[#allocation5 + $0x188] sm:$0xff]  ;;  %v1467_v7 = vpack.c.bf16 %v231_v4, %v230_v2  ;;  %v249_v13 = vld [vmem:[#allocation5 + $0x98] sm:$0xff]  ;;  %s1077_s26 = sshll.u32 %s213_s21, 4  ;;  %s1064_s4 = scalar_lea.sflag [#allocation4], %s2148_s17  ;;  %s2185_s26 = int_to_ptr.vmem [resolvable:$true] %s1077_s26 }
  0x6c   : > { %v1497_v8 = vpack.c.bf16 %v279_v6, %v278_v5  ;;  %v262_v9 = vld [vmem:[#allocation5 + $0x100] sm:$0xff]  ;;  %v263_v10 = vld [vmem:[#allocation5 + $0x108] sm:$0xff]  ;;  %1466 = vmatprep.subr.bf16.mxu0 %v1465_v3  ;;  %v232_v14 = vld [vmem:[#allocation5 + $0x10] sm:$0xff]  ;;  %v1469_v16 = vpack.c.bf16 %v249_v13, %v248_v11  ;;  %s1880_s23 = scalar_lea.vmem %s2185_s26, 128  ;;  %p2244_p0 = scmp.ne.s32.totalorder %s2239_s7, 0 }
  0x6d   : > { %v1499_v12 = vpack.c.bf16 %v263_v10, %v262_v9  ;;  %v233_v15 = vld [vmem:[#allocation5 + $0x18] sm:$0xff]  ;;  %1468 = vmatpush3.bf16.msra.mxu0 %v1467_v7  ;;  %v280_v18 = vld [vmem:[#allocation5 + $0x190] sm:$0xff]  ;;  %v250_v23 = vld [vmem:[#allocation5 + $0xa0] sm:$0xff]  ;;  %p1881_p11 = scmp.ne.s32.totalorder %s2185_s26, %s1880_s23  ;;  %s1957_s16 = smov [#allocation8]  }
  0x6e   : > { %1498 = vmatprep.subr.bf16.mxu1 %v1497_v8  ;;  %v1471_v17 = vpack.c.bf16 %v233_v15, %v232_v14  ;;  %v281_v19 = vld [vmem:[#allocation5 + $0x198] sm:$0xff]  ;;  %v264_v20 = vld [vmem:[#allocation5 + $0x110] sm:$0xff]  ;;  %v251_v24 = vld [vmem:[#allocation5 + $0xa8] sm:$0xff]  ;;  %1470 = vmatprep.subr.bf16.mxu0 %v1469_v16  ;;  %s1884_s6 = sshll.u32 %s1957_s16, 4  ;;  %s1885_s6 = int_to_ptr.vmem [resolvable:$false] %s1884_s6 }
  0x6f   : > { %1500 = vmatpush3.bf16.msra.mxu1 %v1499_v12  ;;  %v1501_v21 = vpack.c.bf16 %v281_v19, %v280_v18  ;;  %v265_v22 = vld [vmem:[#allocation5 + $0x118] sm:$0xff]  ;;  %v1473_v26 = vpack.c.bf16 %v251_v24, %v250_v23  ;;  %v234_v27 = vld [vmem:[#allocation5 + $0x20] sm:$0xff]  ;;  %v235_v28 = vld [vmem:[#allocation5 + $0x28] sm:$0xff]  ;;  %p1882_p1 = pnand %p1881_p11, %p2244_p0  ;;  %s1886_s9 = scalar_lea.vmem %s1885_s6, 256 }
  0x70   : > { %v1503_v25 = vpack.c.bf16 %v265_v22, %v264_v20  ;;  %v282_v29 = vld [vmem:[#allocation5 + $0x1a0] sm:$0xff]  ;;  %v283_v30 = vld [vmem:[#allocation5 + $0x1a8] sm:$0xff]  ;;  %v1475_v33 = vpack.c.bf16 %v235_v28, %v234_v27  ;;  %v252_v35 = vld [vmem:[#allocation5 + $0xb0] sm:$0xff]  ;;  %p1887_p7 = scmp.lt.s32.totalorder %s2185_s26, %s1885_s6  ;;  %p1888_p9 = scmp.lt.s32.totalorder %s1886_s9, %s1880_s23 }
  0x71   : > { %1502 = vmatprep.subr.bf16.mxu1 %v1501_v21  ;;  %v266_v31 = vld [vmem:[#allocation5 + $0x120] sm:$0xff]  ;;  %v267_v32 = vld [vmem:[#allocation5 + $0x128] sm:$0xff]  ;;  %1472 = vmatpush3.bf16.msra.mxu0 %v1471_v17  ;;  %v1505_v34 = vpack.c.bf16 %v283_v30, %v282_v29  ;;  %v253_v36 = vld [vmem:[#allocation5 + $0xb8] sm:$0xff]  ;;  %p1883_p3 = pneg %p1882_p1 }
  0x72   : > { %v236_v37 = vld [vmem:[#allocation5 + $0x30] sm:$0xff]  ;;  %1474 = vmatprep.subr.bf16.mxu0 %v1473_v26  ;;  %v1507_v38 = vpack.c.bf16 %v267_v32, %v266_v31  ;;  %v1477_v39 = vpack.c.bf16 %v253_v36, %v252_v35  ;;  %v237_v40 = vld [vmem:[#allocation5 + $0x38] sm:$0xff]  ;;  %v254_v46 = vld [vmem:[#allocation5 + $0xc0] sm:$0xff]  ;;  %p1889_p12 = por %p1888_p9, %p1887_p7 }
  0x73   : > { %1504 = vmatpush3.bf16.msra.mxu1 %v1503_v25  ;;  %v284_v41 = vld [vmem:[#allocation5 + $0x1b0] sm:$0xff]  ;;  %v285_v42 = vld [vmem:[#allocation5 + $0x1b8] sm:$0xff]  ;;  %v255_v47 = vld [vmem:[#allocation5 + $0xc8] sm:$0xff]  ;;  %v1479_v48 = vpack.c.bf16 %v237_v40, %v236_v37 }
  0x74   : > { %1506 = vmatprep.subr.bf16.mxu1 %v1505_v34  ;;  %v1509_v43 = vpack.c.bf16 %v285_v42, %v284_v41  ;;  %v268_v44 = vld [vmem:[#allocation5 + $0x130] sm:$0xff]  ;;  %v269_v45 = vld [vmem:[#allocation5 + $0x138] sm:$0xff]  ;;  %v286_v49 = vld [vmem:[#allocation5 + $0x1c0] sm:$0xff]  ;;  %v1481_v52 = vpack.c.bf16 %v255_v47, %v254_v46  ;;  %p1890_p2 = pnand %p1889_p12, %p1883_p3 }
  0x75   : > { %1476 = vmatpush3.bf16.msra.mxu0 %v1475_v33  ;;  %v287_v50 = vld [vmem:[#allocation5 + $0x1c8] sm:$0xff]  ;;  %v1511_v51 = vpack.c.bf16 %v269_v45, %v268_v44  ;;  %v238_v53 = vld [vmem:[#allocation5 + $0x40] sm:$0xff]  ;;  %v256_v58 = vld [vmem:[#allocation5 + $0xd0] sm:$0xff] }
  0x76   : > { %1478 = vmatprep.subr.bf16.mxu0 %v1477_v39  ;;  %v239_v54 = vld [vmem:[#allocation5 + $0x48] sm:$0xff]  ;;  %v270_v55 = vld [vmem:[#allocation5 + $0x140] sm:$0xff]  ;;  %v1513_v56 = vpack.c.bf16 %v287_v50, %v286_v49  ;;  %v257_v59 = vld [vmem:[#allocation5 + $0xd8] sm:$0xff] }
  0x77   : > { %1508 = vmatpush3.bf16.msra.mxu1 %v1507_v38  ;;  %v271_v57 = vld [vmem:[#allocation5 + $0x148] sm:$0xff]  ;;  %v288_v60 = vld [vmem:[#allocation5 + $0x1d0] sm:$0xff]  ;;  %v289_v61 = vld [vmem:[#allocation5 + $0x1d8] sm:$0xff]  ;;  %v1483_v62 = vpack.c.bf16 %v239_v54, %v238_v53  ;;  %v1485_v0 = vpack.c.bf16 %v257_v59, %v256_v58 }
  0x78   : > { %1510 = vmatprep.subr.bf16.mxu1 %v1509_v43  ;;  %v1515_v63 = vpack.c.bf16 %v271_v57, %v270_v55  ;;  %v240_v1 = vld [vmem:[#allocation5 + $0x50] sm:$0xff]  ;;  %v241_v2 = vld [vmem:[#allocation5 + $0x58] sm:$0xff]  ;;  %v1517_v4 = vpack.c.bf16 %v289_v61, %v288_v60  ;;  %v258_v6 = vld [vmem:[#allocation5 + $0xe0] sm:$0xff] }
  0x79   : > { %1480 = vmatpush3.bf16.msra.mxu0 %v1479_v48  ;;  %v272_v3 = vld [vmem:[#allocation5 + $0x150] sm:$0xff]  ;;  %v273_v5 = vld [vmem:[#allocation5 + $0x158] sm:$0xff]  ;;  %v259_v7 = vld [vmem:[#allocation5 + $0xe8] sm:$0xff]  ;;  %v1487_v10 = vpack.c.bf16 %v241_v2, %v240_v1 }
  0x7a   : > { %1482 = vmatprep.subr.bf16.mxu0 %v1481_v52  ;;  %v290_v8 = vld [vmem:[#allocation5 + $0x1e0] sm:$0xff]  ;;  %v291_v9 = vld [vmem:[#allocation5 + $0x1e8] sm:$0xff]  ;;  %v1519_v13 = vpack.c.bf16 %v273_v5, %v272_v3  ;;  %v1489_v14 = vpack.c.bf16 %v259_v7, %v258_v6  ;;  %v260_v19 = vld [vmem:[#allocation5 + $0xf0] sm:$0xff] }
  0x7b   : > { %1512 = vmatpush3.bf16.msra.mxu1 %v1511_v51  ;;  %v242_v11 = vld [vmem:[#allocation5 + $0x60] sm:$0xff]  ;;  %v243_v12 = vld [vmem:[#allocation5 + $0x68] sm:$0xff]  ;;  %v1521_v18 = vpack.c.bf16 %v291_v9, %v290_v8  ;;  %v261_v20 = vld [vmem:[#allocation5 + $0xf8] sm:$0xff] }
  0x7c   : > { %1514 = vmatprep.subr.bf16.mxu1 %v1513_v56  ;;  %v274_v15 = vld [vmem:[#allocation5 + $0x160] sm:$0xff]  ;;  %v275_v16 = vld [vmem:[#allocation5 + $0x168] sm:$0xff]  ;;  %v217_v21 = vld [vmem:[%s2152_s29 + $0x18] sm:$0xff]  ;;  %v1491_v24 = vpack.c.bf16 %v243_v12, %v242_v11  ;;  %v1493_v26 = vpack.c.bf16 %v261_v20, %v260_v19 }
  0x7d   : > { %1484 = vmatpush3.bf16.msra.mxu0 %v1483_v62  ;;  %v215_v17 = vld [vmem:[%s2152_s29 + $0x8] sm:$0xff]  ;;  %v292_v22 = vld [vmem:[#allocation5 + $0x1f0] sm:$0xff]  ;;  %v293_v23 = vld [vmem:[#allocation5 + $0x1f8] sm:$0xff]  ;;  %627 = vmatprep.mubr.f32.mxu1 %v217_v21  ;;  %v1523_v25 = vpack.c.bf16 %v275_v16, %v274_v15 }
  0x7e   : > { %1486 = vmatprep.subr.bf16.mxu0 %v1485_v0  ;;  %557 = vmatprep.mubr.f32.mxu0 %v215_v17  ;;  %v244_v27 = vld [vmem:[#allocation5 + $0x70] sm:$0xff]  ;;  %v245_v28 = vld [vmem:[#allocation5 + $0x78] sm:$0xff]  ;;  %v1525_v30 = vpack.c.bf16 %v293_v23, %v292_v22  ;;  %v310_v32 = vld [vmem:[#allocation5 + $0x280] sm:$0xff] }
  0x7f   : > { %1516 = vmatpush3.bf16.msra.mxu1 %v1515_v63  ;;  %v276_v29 = vld [vmem:[#allocation5 + $0x170] sm:$0xff]  ;;  %v277_v31 = vld [vmem:[#allocation5 + $0x178] sm:$0xff]  ;;  %v311_v33 = vld [vmem:[#allocation5 + $0x288] sm:$0xff]  ;;  %v1495_v36 = vpack.c.bf16 %v245_v28, %v244_v27 }
  0x80   : > { %1518 = vmatprep.subr.bf16.mxu1 %v1517_v4  ;;  %v342_v34 = vld [vmem:[#allocation5 + $0x380] sm:$0xff]  ;;  %v343_v35 = vld [vmem:[#allocation5 + $0x388] sm:$0xff]  ;;  %v1527_v37 = vpack.c.bf16 %v277_v31, %v276_v29  ;;  %v1529_v38 = vpack.c.bf16 %v311_v33, %v310_v32  ;;  %v312_v44 = vld [vmem:[#allocation5 + $0x290] sm:$0xff] }
  0x81   : > { %1488 = vmatpush3.bf16.msra.mxu0 %v1487_v10  ;;  %v294_v39 = vld [vmem:[#allocation5 + $0x200] sm:$0xff]  ;;  %v295_v40 = vld [vmem:[#allocation5 + $0x208] sm:$0xff]  ;;  %v1561_v42 = vpack.c.bf16 %v343_v35, %v342_v34  ;;  %v313_v45 = vld [vmem:[#allocation5 + $0x298] sm:$0xff] }
  0x82   : > { %1490 = vmatprep.subr.bf16.mxu0 %v1489_v14  ;;  %v326_v41 = vld [vmem:[#allocation5 + $0x300] sm:$0xff]  ;;  %v327_v43 = vld [vmem:[#allocation5 + $0x308] sm:$0xff]  ;;  %v344_v46 = vld [vmem:[#allocation5 + $0x390] sm:$0xff]  ;;  %v1531_v49 = vpack.c.bf16 %v295_v40, %v294_v39  ;;  %v1533_v52 = vpack.c.bf16 %v313_v45, %v312_v44 }
  0x83   : > { %1520 = vmatpush3.bf16.msra.mxu1 %v1519_v13  ;;  %v345_v47 = vld [vmem:[#allocation5 + $0x398] sm:$0xff]  ;;  %v214_v48 = vld [vmem:[%s2152_s29] sm:$0xff]  ;;  %v216_v50 = vld [vmem:[%s2152_s29 + $0x10] sm:$0xff]  ;;  %v1563_v51 = vpack.c.bf16 %v327_v43, %v326_v41 }
  0x84   : > { %1522 = vmatprep.subr.bf16.mxu1 %v1521_v18  ;;  %v296_v53 = vld [vmem:[#allocation5 + $0x210] sm:$0xff]  ;;  %v297_v54 = vld [vmem:[#allocation5 + $0x218] sm:$0xff]  ;;  %v1565_v56 = vpack.c.bf16 %v345_v47, %v344_v46  ;;  %v314_v58 = vld [vmem:[#allocation5 + $0x2a0] sm:$0xff] }
  0x85   : > { %1492 = vmatpush3.bf16.msra.mxu0 %v1491_v24  ;;  %v328_v55 = vld [vmem:[#allocation5 + $0x310] sm:$0xff]  ;;  %v329_v57 = vld [vmem:[#allocation5 + $0x318] sm:$0xff]  ;;  %v315_v59 = vld [vmem:[#allocation5 + $0x2a8] sm:$0xff]  ;;  %v1535_v62 = vpack.c.bf16 %v297_v54, %v296_v53 }
  0x86   : > { %1494 = vmatprep.subr.bf16.mxu0 %v1493_v26  ;;  %v346_v60 = vld [vmem:[#allocation5 + $0x3a0] sm:$0xff]  ;;  %v347_v61 = vld [vmem:[#allocation5 + $0x3a8] sm:$0xff]  ;;  %v1567_v63 = vpack.c.bf16 %v329_v57, %v328_v55  ;;  %v1537_v0 = vpack.c.bf16 %v315_v59, %v314_v58  ;;  %v316_v6 = vld [vmem:[#allocation5 + $0x2b0] sm:$0xff] }
  0x87   : > { %1524 = vmatpush3.bf16.msra.mxu1 %v1523_v25  ;;  %v298_v1 = vld [vmem:[#allocation5 + $0x220] sm:$0xff]  ;;  %v299_v2 = vld [vmem:[#allocation5 + $0x228] sm:$0xff]  ;;  %v1569_v4 = vpack.c.bf16 %v347_v61, %v346_v60  ;;  %v317_v7 = vld [vmem:[#allocation5 + $0x2b8] sm:$0xff] }
  0x88   : > { %1526 = vmatprep.subr.bf16.mxu1 %v1525_v30  ;;  %v330_v3 = vld [vmem:[#allocation5 + $0x320] sm:$0xff]  ;;  %v331_v5 = vld [vmem:[#allocation5 + $0x328] sm:$0xff]  ;;  %v348_v8 = vld [vmem:[#allocation5 + $0x3b0] sm:$0xff]  ;;  %v1539_v10 = vpack.c.bf16 %v299_v2, %v298_v1  ;;  %v1541_v12 = vpack.c.bf16 %v317_v7, %v316_v6 }
  0x89   : > { %1496 = vmatpush3.bf16.msra.mxu0 %v1495_v36  ;;  %v349_v9 = vld [vmem:[#allocation5 + $0x3b8] sm:$0xff]  ;;  %v1571_v11 = vpack.c.bf16 %v331_v5, %v330_v3  ;;  %v300_v13 = vld [vmem:[#allocation5 + $0x230] sm:$0xff]  ;;  %v318_v18 = vld [vmem:[#allocation5 + $0x2c0] sm:$0xff] }
  0x8a   : > { %1530 = vmatprep.subr.bf16.mxu0 %v1529_v38  ;;  %v301_v14 = vld [vmem:[#allocation5 + $0x238] sm:$0xff]  ;;  %v332_v15 = vld [vmem:[#allocation5 + $0x330] sm:$0xff]  ;;  %v1573_v16 = vpack.c.bf16 %v349_v9, %v348_v8  ;;  %v319_v19 = vld [vmem:[#allocation5 + $0x2c8] sm:$0xff] }
  0x8b   : > { %1528 = vmatpush3.bf16.msra.mxu1 %v1527_v37  ;;  %v333_v17 = vld [vmem:[#allocation5 + $0x338] sm:$0xff]  ;;  %v350_v20 = vld [vmem:[#allocation5 + $0x3c0] sm:$0xff]  ;;  %v351_v21 = vld [vmem:[#allocation5 + $0x3c8] sm:$0xff]  ;;  %v1543_v22 = vpack.c.bf16 %v301_v14, %v300_v13  ;;  %v1545_v26 = vpack.c.bf16 %v319_v19, %v318_v18 }
  0x8c   : > { %1562 = vmatprep.subr.bf16.mxu1 %v1561_v42  ;;  %558 = vmatmul.mubr.f32.vlgmr.msra.gmra.mrb[0].mxu0 %v214_v48  ;;  %v302_v23 = vld [vmem:[#allocation5 + $0x240] sm:$0xff]  ;;  %v219_v24 = vld [vmem:[%s2152_s29 + $0x28] sm:$0xff]  ;;  %v1575_v25 = vpack.c.bf16 %v333_v17, %v332_v15  ;;  %v221_v29 = vld [vmem:[%s2152_s29 + $0x38] sm:$0xff]  ;;  %v1577_v30 = vpack.c.bf16 %v351_v21, %v350_v20 }
  0x8d   : > { %1532 = vmatpush3.bf16.msra.mxu0 %v1531_v49  ;;  %v303_v27 = vld [vmem:[#allocation5 + $0x248] sm:$0xff]  ;;  %v334_v28 = vld [vmem:[#allocation5 + $0x340] sm:$0xff]  ;;  %v320_v32 = vld [vmem:[#allocation5 + $0x2d0] sm:$0xff]  ;;  %697 = vmatprep.mubr.f32.mxu0 %v219_v24 }
  0x8e   : > { %628 = vmatmul.mubr.f32.vlgmr.msra.gmra.mrb[0].mxu1 %v216_v50  ;;  %1534 = vmatprep.subr.bf16.mxu0 %v1533_v52  ;;  %v335_v31 = vld [vmem:[#allocation5 + $0x348] sm:$0xff]  ;;  %v321_v33 = vld [vmem:[#allocation5 + $0x2d8] sm:$0xff]  ;;  %v352_v34 = vld [vmem:[#allocation5 + $0x3d0] sm:$0xff]  ;;  %v1547_v36 = vpack.c.bf16 %v303_v27, %v302_v23 }
  0x8f   : > { %1564 = vmatpush3.bf16.msra.mxu1 %v1563_v51  ;;  %v353_v35 = vld [vmem:[#allocation5 + $0x3d8] sm:$0xff]  ;;  %767 = vmatprep.mubr.f32.mxu1 %v221_v29  ;;  %v1579_v37 = vpack.c.bf16 %v335_v31, %v334_v28  ;;  %v1549_v38 = vpack.c.bf16 %v321_v33, %v320_v32  ;;  %v304_v39 = vld [vmem:[#allocation5 + $0x250] sm:$0xff]  ;;  %v322_v44 = vld [vmem:[#allocation5 + $0x2e0] sm:$0xff] }
  0x90   : > { %1566 = vmatprep.subr.bf16.mxu1 %v1565_v56  ;;  %v305_v40 = vld [vmem:[#allocation5 + $0x258] sm:$0xff]  ;;  %v336_v41 = vld [vmem:[#allocation5 + $0x350] sm:$0xff]  ;;  %v1581_v42 = vpack.c.bf16 %v353_v35, %v352_v34  ;;  %v323_v45 = vld [vmem:[#allocation5 + $0x2e8] sm:$0xff] }
  0x91   : > { %1536 = vmatpush3.bf16.msra.mxu0 %v1535_v62  ;;  %v337_v43 = vld [vmem:[#allocation5 + $0x358] sm:$0xff]  ;;  %v354_v46 = vld [vmem:[#allocation5 + $0x3e0] sm:$0xff]  ;;  %v355_v47 = vld [vmem:[#allocation5 + $0x3e8] sm:$0xff]  ;;  %v1551_v48 = vpack.c.bf16 %v305_v40, %v304_v39  ;;  %v1553_v50 = vpack.c.bf16 %v323_v45, %v322_v44 }
  0x92   : > { %1538 = vmatprep.subr.bf16.mxu0 %v1537_v0  ;;  %v1583_v49 = vpack.c.bf16 %v337_v43, %v336_v41  ;;  %v306_v51 = vld [vmem:[#allocation5 + $0x260] sm:$0xff]  ;;  %v307_v52 = vld [vmem:[#allocation5 + $0x268] sm:$0xff]  ;;  %v1585_v54 = vpack.c.bf16 %v355_v47, %v354_v46  ;;  %v324_v56 = vld [vmem:[#allocation5 + $0x2f0] sm:$0xff] }
  0x93   : > { %1568 = vmatpush3.bf16.msra.mxu1 %v1567_v63  ;;  %v338_v53 = vld [vmem:[#allocation5 + $0x360] sm:$0xff]  ;;  %v339_v55 = vld [vmem:[#allocation5 + $0x368] sm:$0xff]  ;;  %v325_v57 = vld [vmem:[#allocation5 + $0x2f8] sm:$0xff]  ;;  %v1555_v60 = vpack.c.bf16 %v307_v52, %v306_v51 }
  0x94   : > { %1570 = vmatprep.subr.bf16.mxu1 %v1569_v4  ;;  %v356_v58 = vld [vmem:[#allocation5 + $0x3f0] sm:$0xff]  ;;  %v357_v59 = vld [vmem:[#allocation5 + $0x3f8] sm:$0xff]  ;;  %v1587_v61 = vpack.c.bf16 %v339_v55, %v338_v53  ;;  %v1557_v62 = vpack.c.bf16 %v325_v57, %v324_v56  ;;  %v374_v4 = vld [vmem:[#allocation5 + $0x480] sm:$0xff] }
  0x95   : > { %1540 = vmatpush3.bf16.msra.mxu0 %v1539_v10  ;;  %v308_v63 = vld [vmem:[#allocation5 + $0x270] sm:$0xff]  ;;  %v309_v0 = vld [vmem:[#allocation5 + $0x278] sm:$0xff]  ;;  %v1589_v2 = vpack.c.bf16 %v357_v59, %v356_v58  ;;  %v375_v5 = vld [vmem:[#allocation5 + $0x488] sm:$0xff] }
  0x96   : > { %1542 = vmatprep.subr.bf16.mxu0 %v1541_v12  ;;  %v340_v1 = vld [vmem:[#allocation5 + $0x370] sm:$0xff]  ;;  %v341_v3 = vld [vmem:[#allocation5 + $0x378] sm:$0xff]  ;;  %v406_v6 = vld [vmem:[#allocation5 + $0x580] sm:$0xff]  ;;  %v1559_v8 = vpack.c.bf16 %v309_v0, %v308_v63  ;;  %v1593_v10 = vpack.c.bf16 %v375_v5, %v374_v4 }
  0x97   : > { %1572 = vmatpush3.bf16.msra.mxu1 %v1571_v11  ;;  %v407_v7 = vld [vmem:[#allocation5 + $0x588] sm:$0xff]  ;;  %v1591_v9 = vpack.c.bf16 %v341_v3, %v340_v1  ;;  %v358_v11 = vld [vmem:[#allocation5 + $0x400] sm:$0xff]  ;;  %v377_v17 = vld [vmem:[#allocation5 + $0x498] sm:$0xff] }
  0x98   : > { %1574 = vmatprep.subr.bf16.mxu1 %v1573_v16  ;;  %v359_v12 = vld [vmem:[#allocation5 + $0x408] sm:$0xff]  ;;  %v390_v13 = vld [vmem:[#allocation5 + $0x500] sm:$0xff]  ;;  %v1625_v14 = vpack.c.bf16 %v407_v7, %v406_v6  ;;  %v376_v16 = vld [vmem:[#allocation5 + $0x490] sm:$0xff] }
  0x99   : > { %1544 = vmatpush3.bf16.msra.mxu0 %v1543_v22  ;;  %v391_v15 = vld [vmem:[#allocation5 + $0x508] sm:$0xff]  ;;  %v408_v18 = vld [vmem:[#allocation5 + $0x590] sm:$0xff]  ;;  %v409_v19 = vld [vmem:[#allocation5 + $0x598] sm:$0xff]  ;;  %v1595_v21 = vpack.c.bf16 %v359_v12, %v358_v11  ;;  %v1597_v24 = vpack.c.bf16 %v377_v17, %v376_v16 }
  0x9a   : > { %1546 = vmatprep.subr.bf16.mxu0 %v1545_v26  ;;  %v218_v20 = vld [vmem:[%s2152_s29 + $0x20] sm:$0xff]  ;;  %v220_v22 = vld [vmem:[%s2152_s29 + $0x30] sm:$0xff]  ;;  %v1627_v23 = vpack.c.bf16 %v391_v15, %v390_v13  ;;  %v361_v26 = vld [vmem:[#allocation5 + $0x418] sm:$0xff]  ;;  %v1629_v28 = vpack.c.bf16 %v409_v19, %v408_v18 }
  0x9b   : > { %1576 = vmatpush3.bf16.msra.mxu1 %v1575_v25  ;;  %v360_v25 = vld [vmem:[#allocation5 + $0x410] sm:$0xff]  ;;  %v393_v29 = vld [vmem:[#allocation5 + $0x518] sm:$0xff]  ;;  %v379_v31 = vld [vmem:[#allocation5 + $0x4a8] sm:$0xff] }
  0x9c   : > { %1578 = vmatprep.subr.bf16.mxu1 %v1577_v30  ;;  %v392_v27 = vld [vmem:[#allocation5 + $0x510] sm:$0xff]  ;;  %v378_v30 = vld [vmem:[#allocation5 + $0x4a0] sm:$0xff]  ;;  %v411_v33 = vld [vmem:[#allocation5 + $0x5a8] sm:$0xff]  ;;  %v1599_v35 = vpack.c.bf16 %v361_v26, %v360_v25 }
  0x9d   : > { %1548 = vmatpush3.bf16.msra.mxu0 %v1547_v36  ;;  %v410_v32 = vld [vmem:[#allocation5 + $0x5a0] sm:$0xff]  ;;  %v223_v34 = vld [vmem:[%s2152_s29 + $0x48] sm:$0xff]  ;;  %v225_v36 = vld [vmem:[%s2152_s29 + $0x58] sm:$0xff] }
  0x9e   : > { %1550 = vmatprep.subr.bf16.mxu0 %v1549_v38  ;;  %v1601_v38 = vpack.c.bf16 %v379_v31, %v378_v30  ;;  %v362_v39 = vld [vmem:[#allocation5 + $0x420] sm:$0xff]  ;;  %v363_v40 = vld [vmem:[#allocation5 + $0x428] sm:$0xff]  ;;  %v380_v44 = vld [vmem:[#allocation5 + $0x4b0] sm:$0xff] }
  0x9f   : > { %1580 = vmatpush3.bf16.msra.mxu1 %v1579_v37  ;;  %v1631_v37 = vpack.c.bf16 %v393_v29, %v392_v27  ;;  %v394_v41 = vld [vmem:[#allocation5 + $0x520] sm:$0xff]  ;;  %v395_v43 = vld [vmem:[#allocation5 + $0x528] sm:$0xff]  ;;  %v381_v45 = vld [vmem:[#allocation5 + $0x4b8] sm:$0xff] }
  0xa0   : > { %1582 = vmatprep.subr.bf16.mxu1 %v1581_v42  ;;  %v1633_v42 = vpack.c.bf16 %v411_v33, %v410_v32  ;;  %v412_v46 = vld [vmem:[#allocation5 + $0x5b0] sm:$0xff]  ;;  %v413_v47 = vld [vmem:[#allocation5 + $0x5b8] sm:$0xff]  ;;  %v382_v56 = vld [vmem:[#allocation5 + $0x4c0] sm:$0xff] }
  0xa1   : > { %1552 = vmatpush3.bf16.msra.mxu0 %v1551_v48  ;;  %v1603_v48 = vpack.c.bf16 %v363_v40, %v362_v39  ;;  %v364_v51 = vld [vmem:[#allocation5 + $0x430] sm:$0xff]  ;;  %v365_v52 = vld [vmem:[#allocation5 + $0x438] sm:$0xff]  ;;  %v383_v57 = vld [vmem:[#allocation5 + $0x4c8] sm:$0xff] }
  0xa2   : > { %1554 = vmatprep.subr.bf16.mxu0 %v1553_v50  ;;  %v1605_v50 = vpack.c.bf16 %v381_v45, %v380_v44  ;;  %v396_v53 = vld [vmem:[#allocation5 + $0x530] sm:$0xff]  ;;  %v397_v55 = vld [vmem:[#allocation5 + $0x538] sm:$0xff]  ;;  %v414_v58 = vld [vmem:[#allocation5 + $0x5c0] sm:$0xff] }
  0xa3   : > { %1584 = vmatpush3.bf16.msra.mxu1 %v1583_v49  ;;  %v1635_v49 = vpack.c.bf16 %v395_v43, %v394_v41  ;;  %v415_v59 = vld [vmem:[#allocation5 + $0x5c8] sm:$0xff]  ;;  %v366_v63 = vld [vmem:[#allocation5 + $0x440] sm:$0xff]  ;;  %v384_v4 = vld [vmem:[#allocation5 + $0x4d0] sm:$0xff] }
  0xa4   : > { %1586 = vmatprep.subr.bf16.mxu1 %v1585_v54  ;;  %v1637_v54 = vpack.c.bf16 %v413_v47, %v412_v46  ;;  %v367_v0 = vld [vmem:[#allocation5 + $0x448] sm:$0xff]  ;;  %v398_v1 = vld [vmem:[#allocation5 + $0x540] sm:$0xff]  ;;  %v385_v5 = vld [vmem:[#allocation5 + $0x4d8] sm:$0xff] }
  0xa5   : > { %1556 = vmatpush3.bf16.msra.mxu0 %v1555_v60  ;;  %v1607_v60 = vpack.c.bf16 %v365_v52, %v364_v51  ;;  %v399_v3 = vld [vmem:[#allocation5 + $0x548] sm:$0xff]  ;;  %v416_v6 = vld [vmem:[#allocation5 + $0x5d0] sm:$0xff]  ;;  %v417_v7 = vld [vmem:[#allocation5 + $0x5d8] sm:$0xff] }
  0xa6   : > { %1558 = vmatprep.subr.bf16.mxu0 %v1557_v62  ;;  %v1609_v62 = vpack.c.bf16 %v383_v57, %v382_v56  ;;  %v368_v11 = vld [vmem:[#allocation5 + $0x450] sm:$0xff]  ;;  %v369_v12 = vld [vmem:[#allocation5 + $0x458] sm:$0xff]  ;;  %v386_v16 = vld [vmem:[#allocation5 + $0x4e0] sm:$0xff] }
  0xa7   : > { %1588 = vmatpush3.bf16.msra.mxu1 %v1587_v61  ;;  %v1639_v61 = vpack.c.bf16 %v397_v55, %v396_v53  ;;  %v400_v13 = vld [vmem:[#allocation5 + $0x550] sm:$0xff]  ;;  %v401_v15 = vld [vmem:[#allocation5 + $0x558] sm:$0xff]  ;;  %v387_v17 = vld [vmem:[#allocation5 + $0x4e8] sm:$0xff] }
  0xa8   : > { %1590 = vmatprep.subr.bf16.mxu1 %v1589_v2  ;;  %v1641_v2 = vpack.c.bf16 %v415_v59, %v414_v58  ;;  %v418_v18 = vld [vmem:[#allocation5 + $0x5e0] sm:$0xff]  ;;  %v419_v19 = vld [vmem:[#allocation5 + $0x5e8] sm:$0xff]  ;;  %v389_v29 = vld [vmem:[#allocation5 + $0x4f8] sm:$0xff] }
  0xa9   : > { %1560 = vmatpush3.bf16.msra.mxu0 %v1559_v8  ;;  %v1611_v8 = vpack.c.bf16 %v367_v0, %v366_v63  ;;  %v402_v25 = vld [vmem:[#allocation5 + $0x560] sm:$0xff]  ;;  %v1649_v26 = vpack.c.bf16 %v419_v19, %v418_v18  ;;  %v403_v27 = vld [vmem:[#allocation5 + $0x568] sm:$0xff]  ;;  %v420_v30 = vld [vmem:[#allocation5 + $0x5f0] sm:$0xff] }
  0xaa   : > { %1594 = vmatprep.subr.bf16.mxu0 %v1593_v10  ;;  %v1613_v10 = vpack.c.bf16 %v385_v5, %v384_v4  ;;  %v421_v31 = vld [vmem:[#allocation5 + $0x5f8] sm:$0xff]  ;;  %v1651_v33 = vpack.c.bf16 %v403_v27, %v402_v25  ;;  %v438_v40 = vld [vmem:[#allocation5 + $0x680] sm:$0xff]  ;;  %v439_v41 = vld [vmem:[#allocation5 + $0x688] sm:$0xff] }
  0xab   : > { %1592 = vmatpush3.bf16.msra.mxu1 %v1591_v9  ;;  %v1643_v9 = vpack.c.bf16 %v399_v3, %v398_v1  ;;  %v405_v39 = vld [vmem:[#allocation5 + $0x578] sm:$0xff]  ;;  %v471_v43 = vld [vmem:[#allocation5 + $0x788] sm:$0xff]  ;;  %v1657_v46 = vpack.c.bf16 %v439_v41, %v438_v40  ;;  %v422_v47 = vld [vmem:[#allocation5 + $0x600] sm:$0xff] }
  0xac   : > { %1626 = vmatprep.subr.bf16.mxu1 %v1625_v14  ;;  %698 = vmatmul.mubr.f32.vlgmr.msra.gmra.mrb[2].mxu0 %v218_v20  ;;  %v1645_v14 = vpack.c.bf16 %v417_v7, %v416_v6  ;;  %v1615_v20 = vpack.c.bf16 %v369_v12, %v368_v11  ;;  %v455_v51 = vld [vmem:[#allocation5 + $0x708] sm:$0xff]  ;;  %v440_v52 = vld [vmem:[#allocation5 + $0x690] sm:$0xff]  ;;  %v441_v53 = vld [vmem:[#allocation5 + $0x698] sm:$0xff] }
  0xad   : > { %1596 = vmatpush3.bf16.msra.mxu0 %v1595_v21  ;;  %837 = vmatprep.mubr.f32.mxu0 %v223_v34  ;;  %v1647_v21 = vpack.c.bf16 %v401_v15, %v400_v13  ;;  %v473_v55 = vld [vmem:[#allocation5 + $0x798] sm:$0xff]  ;;  %v222_v56 = vld [vmem:[%s2152_s29 + $0x40] sm:$0xff]  ;;  %v224_v58 = vld [vmem:[%s2152_s29 + $0x50] sm:$0xff] }
  0xae   : > { %768 = vmatmul.mubr.f32.vlgmr.msra.gmra.mrb[2].mxu1 %v220_v22  ;;  %1598 = vmatprep.subr.bf16.mxu0 %v1597_v24  ;;  %v1617_v22 = vpack.c.bf16 %v387_v17, %v386_v16  ;;  %v371_v24 = vld [vmem:[#allocation5 + $0x468] sm:$0xff]  ;;  %v456_v63 = vld [vmem:[#allocation5 + $0x710] sm:$0xff]  ;;  %v457_v1 = vld [vmem:[#allocation5 + $0x718] sm:$0xff] }
  0xaf   : > { %1628 = vmatpush3.bf16.msra.mxu1 %v1627_v23  ;;  %907 = vmatprep.mubr.f32.mxu1 %v225_v36  ;;  %v370_v23 = vld [vmem:[#allocation5 + $0x460] sm:$0xff]  ;;  %v373_v36 = vld [vmem:[#allocation5 + $0x478] sm:$0xff]  ;;  %v443_v3 = vld [vmem:[#allocation5 + $0x6a8] sm:$0xff] }
  0xb0   : > { %1630 = vmatprep.subr.bf16.mxu1 %v1629_v28  ;;  %v388_v28 = vld [vmem:[#allocation5 + $0x4f0] sm:$0xff]  ;;  %v1619_v32 = vpack.c.bf16 %v371_v24, %v370_v23  ;;  %v474_v4 = vld [vmem:[#allocation5 + $0x7a0] sm:$0xff]  ;;  %v475_v5 = vld [vmem:[#allocation5 + $0x7a8] sm:$0xff] }
  0xb1   : > { %1600 = vmatpush3.bf16.msra.mxu0 %v1599_v35  ;;  %v1621_v34 = vpack.c.bf16 %v389_v29, %v388_v28  ;;  %v372_v35 = vld [vmem:[#allocation5 + $0x470] sm:$0xff]  ;;  %v227_v6 = vld [vmem:[%s2152_s29 + $0x68] sm:$0xff]  ;;  %v426_v11 = vld [vmem:[#allocation5 + $0x620] sm:$0xff] }
  0xb2   : > { %1602 = vmatprep.subr.bf16.mxu0 %v1601_v38  ;;  %v1653_v38 = vpack.c.bf16 %v421_v31, %v420_v30  ;;  %v1623_v44 = vpack.c.bf16 %v373_v36, %v372_v35  ;;  %v427_v12 = vld [vmem:[#allocation5 + $0x628] sm:$0xff]  ;;  %v458_v13 = vld [vmem:[#allocation5 + $0x720] sm:$0xff]  ;;  %v444_v16 = vld [vmem:[#allocation5 + $0x6b0] sm:$0xff] }
  0xb3   : > { %1632 = vmatpush3.bf16.msra.mxu1 %v1631_v37  ;;  %v404_v37 = vld [vmem:[#allocation5 + $0x570] sm:$0xff]  ;;  %v459_v15 = vld [vmem:[#allocation5 + $0x728] sm:$0xff]  ;;  %v445_v17 = vld [vmem:[#allocation5 + $0x6b8] sm:$0xff] }
  0xb4   : > { %1634 = vmatprep.subr.bf16.mxu1 %v1633_v42  ;;  %v470_v42 = vld [vmem:[#allocation5 + $0x780] sm:$0xff]  ;;  %v1655_v45 = vpack.c.bf16 %v405_v39, %v404_v37  ;;  %v476_v18 = vld [vmem:[#allocation5 + $0x7b0] sm:$0xff]  ;;  %v477_v19 = vld [vmem:[#allocation5 + $0x7b8] sm:$0xff] }
  0xb5   : > { %1604 = vmatpush3.bf16.msra.mxu0 %v1603_v48  ;;  %v423_v48 = vld [vmem:[#allocation5 + $0x608] sm:$0xff]  ;;  %v428_v23 = vld [vmem:[#allocation5 + $0x630] sm:$0xff]  ;;  %v429_v24 = vld [vmem:[#allocation5 + $0x638] sm:$0xff] }
  0xb6   : > { %1606 = vmatprep.subr.bf16.mxu0 %v1605_v50  ;;  %v1689_v50 = vpack.c.bf16 %v471_v43, %v470_v42  ;;  %v1659_v57 = vpack.c.bf16 %v423_v48, %v422_v47  ;;  %v460_v25 = vld [vmem:[#allocation5 + $0x730] sm:$0xff]  ;;  %v461_v27 = vld [vmem:[#allocation5 + $0x738] sm:$0xff]  ;;  %v446_v28 = vld [vmem:[#allocation5 + $0x6c0] sm:$0xff] }
  0xb7   : > { %1636 = vmatpush3.bf16.msra.mxu1 %v1635_v49  ;;  %v454_v49 = vld [vmem:[#allocation5 + $0x700] sm:$0xff]  ;;  %v447_v29 = vld [vmem:[#allocation5 + $0x6c8] sm:$0xff]  ;;  %v448_v40 = vld [vmem:[#allocation5 + $0x6d0] sm:$0xff] }
  0xb8   : > { %1638 = vmatprep.subr.bf16.mxu1 %v1637_v54  ;;  %v472_v54 = vld [vmem:[#allocation5 + $0x790] sm:$0xff]  ;;  %v1691_v59 = vpack.c.bf16 %v455_v51, %v454_v49  ;;  %v478_v30 = vld [vmem:[#allocation5 + $0x7c0] sm:$0xff]  ;;  %v479_v31 = vld [vmem:[#allocation5 + $0x7c8] sm:$0xff] }
  0xb9   : > { %1608 = vmatpush3.bf16.msra.mxu0 %v1607_v60  ;;  %v1661_v60 = vpack.c.bf16 %v441_v53, %v440_v52  ;;  %v1693_v0 = vpack.c.bf16 %v473_v55, %v472_v54  ;;  %v430_v35 = vld [vmem:[#allocation5 + $0x640] sm:$0xff]  ;;  %v431_v36 = vld [vmem:[#allocation5 + $0x648] sm:$0xff]  ;;  %v449_v41 = vld [vmem:[#allocation5 + $0x6d8] sm:$0xff] }
  0xba   : > { %1610 = vmatprep.subr.bf16.mxu0 %v1609_v62  ;;  %v425_v62 = vld [vmem:[#allocation5 + $0x618] sm:$0xff]  ;;  %v462_v37 = vld [vmem:[#allocation5 + $0x740] sm:$0xff]  ;;  %v463_v39 = vld [vmem:[#allocation5 + $0x748] sm:$0xff] }
  0xbb   : > { %1640 = vmatpush3.bf16.msra.mxu1 %v1639_v61  ;;  %v424_v61 = vld [vmem:[#allocation5 + $0x610] sm:$0xff]  ;;  %v481_v43 = vld [vmem:[#allocation5 + $0x7d8] sm:$0xff]  ;;  %v450_v52 = vld [vmem:[#allocation5 + $0x6e0] sm:$0xff] }
  0xbc   : > { %1642 = vmatprep.subr.bf16.mxu1 %v1641_v2  ;;  %v442_v2 = vld [vmem:[#allocation5 + $0x6a0] sm:$0xff]  ;;  %v1663_v7 = vpack.c.bf16 %v425_v62, %v424_v61  ;;  %v480_v42 = vld [vmem:[#allocation5 + $0x7d0] sm:$0xff]  ;;  %v433_v48 = vld [vmem:[#allocation5 + $0x658] sm:$0xff] }
  0xbd   : > { %1612 = vmatpush3.bf16.msra.mxu0 %v1611_v8  ;;  %v229_v8 = vld [vmem:[%s2152_s29 + $0x78] sm:$0xff]  ;;  %v432_v47 = vld [vmem:[#allocation5 + $0x650] sm:$0xff]  ;;  %v451_v53 = vld [vmem:[#allocation5 + $0x6e8] sm:$0xff] }
  0xbe   : > { %1614 = vmatprep.subr.bf16.mxu0 %v1613_v10  ;;  %v1665_v10 = vpack.c.bf16 %v443_v3, %v442_v2  ;;  %v464_v49 = vld [vmem:[#allocation5 + $0x750] sm:$0xff]  ;;  %v465_v51 = vld [vmem:[#allocation5 + $0x758] sm:$0xff]  ;;  %v482_v54 = vld [vmem:[#allocation5 + $0x7e0] sm:$0xff] }
  0xbf   : > { %1644 = vmatpush3.bf16.msra.mxu1 %v1643_v9  ;;  %v1695_v9 = vpack.c.bf16 %v457_v1, %v456_v63  ;;  %v483_v55 = vld [vmem:[#allocation5 + $0x7e8] sm:$0xff]  ;;  %v466_v61 = vld [vmem:[#allocation5 + $0x760] sm:$0xff]  ;;  %v453_v1 = vld [vmem:[#allocation5 + $0x6f8] sm:$0xff] }
  0xc0   : > { %1646 = vmatprep.subr.bf16.mxu1 %v1645_v14  ;;  %v1697_v14 = vpack.c.bf16 %v475_v5, %v474_v4  ;;  %v1713_v62 = vpack.c.bf16 %v483_v55, %v482_v54  ;;  %v467_v63 = vld [vmem:[#allocation5 + $0x768] sm:$0xff]  ;;  %v484_v2 = vld [vmem:[#allocation5 + $0x7f0] sm:$0xff]  ;;  %v485_v3 = vld [vmem:[#allocation5 + $0x7f8] sm:$0xff] }
  0xc1   : > { %1616 = vmatpush3.bf16.msra.mxu0 %v1615_v20  ;;  %v1667_v20 = vpack.c.bf16 %v427_v12, %v426_v11  ;;  %v1715_v5 = vpack.c.bf16 %v467_v63, %v466_v61  ;;  %v469_v11 = vld [vmem:[#allocation5 + $0x778] sm:$0xff] }
  0xc2   : > { %1618 = vmatprep.subr.bf16.mxu0 %v1617_v22  ;;  %v1669_v22 = vpack.c.bf16 %v445_v17, %v444_v16  ;;  %v1179_v17 = vld [vmem:[#allocation7] ss:$0 sm:$0xff] }
  0xc3   : > { %1648 = vmatpush3.bf16.msra.mxu1 %v1647_v21  ;;  %v1699_v21 = vpack.c.bf16 %v459_v15, %v458_v13  ;;  %v228_v15 = vld [vmem:[%s2152_s29 + $0x70] sm:$0xff] }
  0xc4   : > { %1650 = vmatprep.subr.bf16.mxu1 %v1649_v26  ;;  %v1701_v26 = vpack.c.bf16 %v477_v19, %v476_v18 }
  0xc5   : > { %1620 = vmatpush3.bf16.msra.mxu0 %v1619_v32  ;;  %v1671_v32 = vpack.c.bf16 %v429_v24, %v428_v23 }
  0xc6   : > { %1622 = vmatprep.subr.bf16.mxu0 %v1621_v34  ;;  %v1673_v34 = vpack.c.bf16 %v447_v29, %v446_v28 }
  0xc7   : > { %1652 = vmatpush3.bf16.msra.mxu1 %v1651_v33  ;;  %v1703_v33 = vpack.c.bf16 %v461_v27, %v460_v25 }
  0xc8   : > { %1654 = vmatprep.subr.bf16.mxu1 %v1653_v38  ;;  %v1705_v38 = vpack.c.bf16 %v479_v31, %v478_v30 }
  0xc9   : > { %1624 = vmatpush3.bf16.msra.mxu0 %v1623_v44  ;;  %v1675_v44 = vpack.c.bf16 %v431_v36, %v430_v35 }
  0xca   : > { %1658 = vmatprep.subr.bf16.mxu0 %v1657_v46  ;;  %v1677_v46 = vpack.c.bf16 %v449_v41, %v448_v40 }
  0xcb   : > { %1656 = vmatpush3.bf16.msra.mxu1 %v1655_v45  ;;  %v1707_v45 = vpack.c.bf16 %v463_v39, %v462_v37 }
  0xcc   : > { %1690 = vmatprep.subr.bf16.mxu1 %v1689_v50  ;;  %838 = vmatmul.mubr.f32.vlgmr.msra.gmra.mrb[4].mxu0 %v222_v56  ;;  %v1709_v50 = vpack.c.bf16 %v481_v43, %v480_v42  ;;  %v1679_v56 = vpack.c.bf16 %v433_v48, %v432_v47 }
  0xcd   : > { %1660 = vmatpush3.bf16.msra.mxu0 %v1659_v57  ;;  %977 = vmatprep.mubr.f32.mxu0 %v227_v6  ;;  %v1711_v57 = vpack.c.bf16 %v465_v51, %v464_v49 }
  0xce   : > { %908 = vmatmul.mubr.f32.vlgmr.msra.gmra.mrb[4].mxu1 %v224_v58  ;;  %1662 = vmatprep.subr.bf16.mxu0 %v1661_v60  ;;  %v1681_v58 = vpack.c.bf16 %v451_v53, %v450_v52  ;;  %v435_v60 = vld [vmem:[#allocation5 + $0x668] sm:$0xff] }
  0xcf   : > { %1692 = vmatpush3.bf16.msra.mxu1 %v1691_v59  ;;  %1047 = vmatprep.mubr.f32.mxu1 %v229_v8  ;;  %v434_v59 = vld [vmem:[#allocation5 + $0x660] sm:$0xff]  ;;  %v437_v8 = vld [vmem:[#allocation5 + $0x678] sm:$0xff] }
  0xd0   : > { %1694 = vmatprep.subr.bf16.mxu1 %v1693_v0  ;;  %v452_v0 = vld [vmem:[#allocation5 + $0x6f0] sm:$0xff]  ;;  %v1683_v4 = vpack.c.bf16 %v435_v60, %v434_v59 }
  0xd1   : > { %1664 = vmatpush3.bf16.msra.mxu0 %v1663_v7  ;;  %v1685_v6 = vpack.c.bf16 %v453_v1, %v452_v0  ;;  %v436_v7 = vld [vmem:[#allocation5 + $0x670] sm:$0xff] }
  0xd2   : > { %1666 = vmatprep.subr.bf16.mxu0 %v1665_v10  ;;  %v468_v10 = vld [vmem:[#allocation5 + $0x770] sm:$0xff]  ;;  %v1687_v12 = vpack.c.bf16 %v437_v8, %v436_v7 }
  0xd3   : > { %1696 = vmatpush3.bf16.msra.mxu1 %v1695_v9  ;;  %v1717_v9 = vpack.c.bf16 %v485_v3, %v484_v2  ;;  %v1719_v13 = vpack.c.bf16 %v469_v11, %v468_v10 }
  0xd4   : > { %1698 = vmatprep.subr.bf16.mxu1 %v1697_v14  ;;  %v226_v14 = vld [vmem:[%s2152_s29 + $0x60] sm:$0xff] }
  0xd5   : > { %1668 = vmatpush3.bf16.msra.mxu0 %v1667_v20 }
  0xd6   : > { %1670 = vmatprep.subr.bf16.mxu0 %v1669_v22 }
  0xd7   : > { %1700 = vmatpush3.bf16.msra.mxu1 %v1699_v21 }
  0xd8   : > { %1702 = vmatprep.subr.bf16.mxu1 %v1701_v26 }
  0xd9   : > { %1672 = vmatpush3.bf16.msra.mxu0 %v1671_v32 }
  0xda   : > { %1674 = vmatprep.subr.bf16.mxu0 %v1673_v34 }
  0xdb   : > { %1704 = vmatpush3.bf16.msra.mxu1 %v1703_v33 }
  0xdc   : > { %1706 = vmatprep.subr.bf16.mxu1 %v1705_v38 }
  0xdd   : > { %1676 = vmatpush3.bf16.msra.mxu0 %v1675_v44 }
  0xde   : > { %1678 = vmatprep.subr.bf16.mxu0 %v1677_v46 }
  0xdf   : > { %1708 = vmatpush3.bf16.msra.mxu1 %v1707_v45 }
  0xe0   : > { %1710 = vmatprep.subr.bf16.mxu1 %v1709_v50 }
  0xe1   : > { %1680 = vmatpush3.bf16.msra.mxu0 %v1679_v56 }
  0xe2   : > { %1682 = vmatprep.subr.bf16.mxu0 %v1681_v58 }
  0xe3   : > { %1712 = vmatpush3.bf16.msra.mxu1 %v1711_v57 }
  0xe4   : > { %1714 = vmatprep.subr.bf16.mxu1 %v1713_v62 }
  0xe5   : > { %1684 = vmatpush3.bf16.msra.mxu0 %v1683_v4 }
  0xe6   : > { %1686 = vmatprep.subr.bf16.mxu0 %v1685_v6 }
  0xe7   : > { %1716 = vmatpush3.bf16.msra.mxu1 %v1715_v5 }
  0xe8   : > { %1718 = vmatprep.subr.bf16.mxu1 %v1717_v9 }
  0xe9   : > { %1688 = vmatpush3.bf16.msra.mxu0 %v1687_v12 }
  0xeb   : > { %1720 = vmatpush3.bf16.msra.mxu1 %v1719_v13 }
  0xec   : > { %978 = vmatmul.mubr.f32.vlgmr.msra.gmra.mrb[6].mxu0 %v226_v14 }
  0xee   : > { %1048 = vmatmul.mubr.f32.vlgmr.msra.gmra.mrb[6].mxu1 %v228_v15 }
 0x15f   : > { %v1217_v16 = vpop.f32.mrb[0].mxu0 }
 0x160   : > { %v1218_v18 = vpop.f32.mrb[1].mxu0 }
 0x161   : > { %v1252_v19 = vpop.f32.mrb[0].mxu1  ;;  %v1219_v20 = vadd.f32 %v1218_v18, %v1217_v16 }
 0x162   : > { %v1253_v21 = vpop.f32.mrb[1].mxu1 }
 0x163   : > { %v1254_v22 = vadd.f32 %v1253_v21, %v1252_v19  ;;  %v560_v23 = vadd.f32 %v1219_v20, %v1179_v17 }
 0x165   : > { %v630_v24 = vadd.f32 %v1254_v22, %v560_v23 }
 0x17f   : > { %v1287_v25 = vpop.f32.mrb[2].mxu0 }
 0x180   : > { %v1288_v26 = vpop.f32.mrb[3].mxu0 }
 0x181   : > { %v1322_v27 = vpop.f32.mrb[2].mxu1  ;;  %v1289_v28 = vadd.f32 %v1288_v26, %v1287_v25 }
 0x182   : > { %v1323_v29 = vpop.f32.mrb[3].mxu1 }
 0x183   : > { %v1324_v30 = vadd.f32 %v1323_v29, %v1322_v27  ;;  %v700_v31 = vadd.f32 %v1289_v28, %v630_v24 }
 0x185   : > { %v770_v32 = vadd.f32 %v1324_v30, %v700_v31 }
 0x19f   : > { %v1357_v33 = vpop.f32.mrb[4].mxu0 }
 0x1a0   : > { %v1358_v34 = vpop.f32.mrb[5].mxu0 }
 0x1a1   : > { %v1392_v35 = vpop.f32.mrb[4].mxu1  ;;  %v1359_v36 = vadd.f32 %v1358_v34, %v1357_v33 }
 0x1a2   : > { %v1393_v37 = vpop.f32.mrb[5].mxu1 }
 0x1a3   : > { %v1394_v38 = vadd.f32 %v1393_v37, %v1392_v35  ;;  %v840_v39 = vadd.f32 %v1359_v36, %v770_v32 }
 0x1a5   : > { %v910_v40 = vadd.f32 %v1394_v38, %v840_v39 }
 0x1bf   : > { %v1427_v41 = vpop.f32.mrb[6].mxu0 }
 0x1c0   : > { %v1428_v42 = vpop.f32.mrb[7].mxu0 }
 0x1c1   : > { %v1462_v43 = vpop.f32.mrb[6].mxu1  ;;  %v1429_v44 = vadd.f32 %v1428_v42, %v1427_v41 }
 0x1c2   : > { %v1463_v45 = vpop.f32.mrb[7].mxu1 }
 0x1c3   : > { %v1464_v46 = vadd.f32 %v1463_v45, %v1462_v43  ;;  %v980_v47 = vadd.f32 %v1429_v44, %v910_v40 }
 0x1c5   : > { %v1050_v48 = vadd.f32 %v1464_v46, %v980_v47 }
 0x1c7   : > { %1053 = vmax.xlane.f32.xlu0 %v1050_v48 }
 0x254   : > { %v1054_v49 = vpop.xlane.xlu0 %1053 }
 0x255   : > { %v1055_v50 = vsub.f32 %v1050_v48, %v1054_v49 }
 0x257   : > { %v1056_v51 = vmul.f32 1.442695, %v1055_v50 }
 0x259   : > { %1790 = vpow2.f32 %v1056_v51 }
 0x263   : > { %v1791_v52 = vpop.eup %1790 }
 0x264   : > { %1058 = vadd.xlane.f32.xlu0 %v1791_v52 }
 0x2f1   : > { %v1059_v53 = vpop.xlane.xlu0 %1058 }
 0x2f2   : > { %1792 = vrcp.f32 %v1059_v53 }
 0x2fc   : > { %v1793_v54 = vpop.eup %1792 }
 0x2fd   : > { %v1061_v55 = vmul.f32 %v1793_v54, %v1791_v52 }
 0x2ff   : > { %1062 = vst [vmem:[%s213_s21] sm:$0xff] %v1061_v55 }
 0x300   : > { %1893 = shalt.err (!%p1890_p2)
}
 0x301   : > { %s1894_s10 = scalar_lea.hbm %s2183_s30, 128  ;;  %s1898_s17 = scalar_lea.hbm %s2230_s3, 256 }
 0x302   : > { %p1895_p13 = scmp.ne.s32.totalorder %s2183_s30, %s1894_s10  ;;  %p1899_p4 = scmp.lt.u32.totalorder %s2183_s30, %s2230_s3 }
 0x303   : > { %p1900_p5 = scmp.lt.u32.totalorder %s1898_s17, %s1894_s10  ;;  %p1902_p11 = scmp.lt.u32.totalorder %s1894_s10, %s2183_s30 }
 0x304   : > { %p1896_p6 = pnand %p1895_p13, %p2244_p0 }
 0x305   : > { %p1901_p8 = por %p1900_p5, %p1899_p4 }
 0x306   : > { %p1897_p10 = pneg %p1896_p6 }
 0x307   : > { %p1903_p1 = por %p1902_p11, %p1901_p8 }
 0x309   : > { %p1904_p3 = pnand %p1903_p1, %p1897_p10 }
 0x30b   : > { %1907 = shalt.err (!%p1904_p3)
}
 0x30c   : > { %1731 = dma.vmem_to_hbm [thread:$0]  (%p2244_p0), %s2185_s26, 128, %s2183_s30, %s1064_s4  }
 0x30d PF: > { %s1089_s29 = sand.u32 1, %s1938_s12   ;;  %p2245_p7 = scmp.ne.s32.totalorder %s2235_s19, 0 }
 0x30e   : > { %p2246_p9 = scmp.ge.s32.totalorder %s1950_s15, 2  ;;  %s1090_s18 = scalar_lea.sflag [#allocation4], %s1089_s29 }
 0x310   : > { %p1745_p12 = pnand %p2246_p9, %p2245_p7 }
 0x312   : > { %1933 = dma.done.wait (!%p1745_p12), %s1090_s18, 128  }
 0x313   : > { %1935 = vsyncadd (!%p1745_p12), %s1090_s18, 4294967168  ;;  %p17_p2 = scmp.ge.s32.totalorder %s2089_s5, 4   ;;  %s2247_s12 = smov %s1942_s13 }
 0x314   : > { %s2248_s13 = smov %s1946_s14  ;;  %s2249_s14 = smov %s2105_s8 }
 0x315   : > { %s2250_s15 = smov %s2089_s5  ;;  %19 = sbr.rel (!%p17_p2) target bundleno = 6 (0x6), region = 85 }
 0x31c   :  { %1095 = vsyncpa [#allocation3], 1 }
 0x31d   :  { %1097 = vsyncpa [#allocation3 + $0x1], 1 }
 0x31e   :  { %1098 = vsyncpa [#allocation6], 1 }
 0x31f   :  { %1099 = vsyncpa [#allocation4], 1 }
 0x320   :  { %1101 = vsyncpa [#allocation4 + $0x1], 1 }

</bundles_post_ra>
